<compile_context>
chip_gen: v6e
topology: v6e:2x2x1
jax: 0.10.0
libtpu: 0.0.40
codegen_flags: <defaults>
</compile_context>

<pallas_src>
import functools

import jax
import jax.numpy as jnp
import numpy as np
from jax.experimental import pallas as pl
from jax.experimental.pallas import tpu as pltpu

KSIZE = 7
PAD = 3        # kernel_size 7 -> padding 3 (PyTorch semantics)
LANE = 128     # TPU lane width


def _spatial_attention_kernel(w_ref, rmask_ref, cmask_ref, x_ref, o_ref,
                              sum_ref, max_ref, *, W, L):
    """Grid = (batch blocks ["parallel"], channel blocks ["arbitrary"]).

    w_ref:     SMEM (2*7*7,) f32 conv weights; avg-channel pre-scaled by 1/C
    rmask_ref: VMEM (7, 1, L) f32 row-validity masks (indexed by ky)
    cmask_ref: VMEM (7, 1, L) f32 column-validity masks (indexed by kx)
    x_ref:     VMEM (block_n, c_tile, L)
    o_ref:     VMEM (block_n, 1, L)
    sum_ref:   VMEM scratch (block_n, 1, L) f32 -- running channel sum
    max_ref:   VMEM scratch (block_n, 1, L) f32 -- running channel max
    """
    cb = pl.program_id(1)

    @pl.when(cb == 0)
    def _init():
        sum_ref[...] = jnp.zeros_like(sum_ref)
        max_ref[...] = jnp.full_like(max_ref, -jnp.inf)

    # Channel-tile reduction: one load of the (block_n, c_tile, L) tile feeds
    # both the sum and the max accumulators.
    x = x_ref[...].astype(jnp.float32)
    sum_ref[...] += jnp.sum(x, axis=1, keepdims=True)
    max_ref[...] = jnp.maximum(max_ref[...], jnp.max(x, axis=1, keepdims=True))

    @pl.when(cb == pl.num_programs(1) - 1)
    def _conv_and_store():
        # maps[0] = channel sum (1/C folded into its weights), maps[1] = max.
        maps = (sum_ref[...], max_ref[...])            # (block_n, 1, L) f32

        # Per-kx partials: P[kx] = sum_{c,ky} w[c,ky,kx] * roll(m_c, -dy*W),
        # with rolled-around (invalid) rows zeroed by the row mask.  Valid
        # output positions never actually read a wrapped lane (their flat
        # sample index stays in [0, L)); wrapped values only land where the
        # row/column masks zero the contribution.
        partials = [None] * KSIZE
        for ky in range(KSIZE):
            dy = ky - PAD
            shift_y = (-dy * W) % L
            rmask = rmask_ref[ky] if dy != 0 else None      # (1, L)
            for c in range(2):
                r = maps[c]
                if shift_y:
                    r = pltpu.roll(r, shift_y, axis=2)
                if rmask is not None:
                    r = r * rmask
                for kx in range(KSIZE):
                    w = w_ref[c * KSIZE * KSIZE + ky * KSIZE + kx]
                    t = w * r
                    partials[kx] = t if partials[kx] is None else partials[kx] + t

        # Final kx shifts (6 rolls) + column masks (kill cross-row leakage of
        # the flat-layout lane shift).  kx == PAD needs neither.
        acc = partials[PAD]
        for kx in range(KSIZE):
            dx = kx - PAD
            if dx == 0:
                continue
            rolled = pltpu.roll(partials[kx], (-dx) % L, axis=2)
            acc = acc + cmask_ref[kx] * rolled

        o_ref[...] = jax.nn.sigmoid(acc).astype(o_ref.dtype)


def _build_masks(H, W):
    """Row/column validity masks for every tap offset, shape (7, 1, H*W)."""
    L = H * W
    pos = np.arange(L)
    rows, cols = pos // W, pos % W
    rmask = np.zeros((KSIZE, 1, L), np.float32)
    cmask = np.zeros((KSIZE, 1, L), np.float32)
    for k in range(KSIZE):
        d = k - PAD
        rmask[k, 0] = ((rows + d >= 0) & (rows + d < H)).astype(np.float32)
        cmask[k, 0] = ((cols + d >= 0) & (cols + d < W)).astype(np.float32)
    return jnp.asarray(rmask), jnp.asarray(cmask)


def _round_up(v, m):
    return -(-v // m) * m


def _vmem_capacity_bytes():
    try:
        return int(pltpu.get_tpu_info().vmem_capacity_bytes)
    except Exception:
        return 64 << 20   # conservative fallback (v7x per-core physical VMEM)


def _pick_tiles(N, C, L, x_itemsize, budget):
    """Pick (block_n, c_tile): divisors of N / C, sized to the VMEM budget."""
    lane_l = _round_up(L, LANE)

    def block_bytes(bn, ct):
        x_blk = bn * _round_up(ct, 8) * lane_l * x_itemsize   # x tile (sublane pad)
        acc = 2 * bn * 8 * lane_l * 4                          # sum/max scratch
        out_b = bn * 8 * lane_l * x_itemsize                   # output tile
        msk = 2 * KSIZE * 8 * lane_l * 4                       # row/col masks
        return 2 * x_blk + 2 * out_b + acc + msk               # double-buffered in/out

    # Channel tiles: full C, or multiples of 8 that divide C (Mosaic tiling rule).
    c_cands = sorted({C, *[ct for ct in range(8, C, 8) if C % ct == 0]})
    # Batch tiles: divisors of N, capped so the "parallel" grid axis has >= 2
    # steps whenever N >= 2 (keeps both v7x TensorCores busy).
    bn_cap = N if N < 2 else max(1, N // 2)
    bn_cands = [bn for bn in range(1, bn_cap + 1) if N % bn == 0]

    best, best_score = (1, C), -1
    for ct in c_cands:
        for bn in bn_cands:
            if block_bytes(bn, ct) > budget:
                continue
            # Bound vreg pressure from the ~12 live (bn, 1, L) conv values.
            if bn * lane_l * 4 > (64 << 10):
                continue
            score = bn * ct                   # bytes of x moved per grid step
            if score > best_score:
                best_score, best = score, (bn, ct)
    return best


def spatial_attention(x, conv_weight, *, block_n=None, c_tile=None):
    """x: (N, C, H, W); conv_weight: (1, 2, 7, 7).  Returns (N, 1, H, W)."""
    N, C, H, W = x.shape
    assert conv_weight.shape == (1, 2, KSIZE, KSIZE)
    L = H * W

    # Fold the 1/C of the channel mean into the avg-channel weights.
    w = conv_weight.astype(jnp.float32).reshape(2, KSIZE, KSIZE)
    w = w.at[0].multiply(1.0 / C)
    w_flat = w.reshape(-1)                                  # (98,) -> SMEM

    rmask, cmask = _build_masks(H, W)

    cap = _vmem_capacity_bytes()
    if block_n is None or c_tile is None:
        bn, ct = _pick_tiles(N, C, L, x.dtype.itemsize, int(cap * 0.45))
        block_n = bn if block_n is None else block_n
        c_tile = ct if c_tile is None else c_tile
    assert N % block_n == 0 and C % c_tile == 0

    grid = (N // block_n, C // c_tile)
    x_flat = x.reshape(N, C, L)                             # free: NCHW contiguous

    kernel = functools.partial(_spatial_attention_kernel, W=W, L=L)

    out = pl.pallas_call(
        kernel,
        out_shape=jax.ShapeDtypeStruct((N, 1, L), x.dtype),
        grid_spec=pltpu.PrefetchScalarGridSpec(
            num_scalar_prefetch=0,
            grid=grid,
            in_specs=[
                pl.BlockSpec(memory_space=pltpu.MemorySpace.SMEM),      # weights
                pl.BlockSpec((KSIZE, 1, L), lambda n, cb: (0, 0, 0)),   # row masks
                pl.BlockSpec((KSIZE, 1, L), lambda n, cb: (0, 0, 0)),   # col masks
                pl.BlockSpec((block_n, c_tile, L), lambda n, cb: (n, cb, 0)),
            ],
            out_specs=pl.BlockSpec((block_n, 1, L), lambda n, cb: (n, 0, 0)),
            scratch_shapes=[
                pltpu.VMEM((block_n, 1, L), jnp.float32),   # running channel sum
                pltpu.VMEM((block_n, 1, L), jnp.float32),   # running channel max
            ],
        ),
        compiler_params=pltpu.CompilerParams(
            dimension_semantics=("parallel", "arbitrary"),
            vmem_limit_bytes=min(int(cap * 0.7), 100 << 20),
        ),
    )(w_flat, rmask, cmask, x_flat)

    return out.reshape(N, 1, H, W)


def _reference(x, conv_weight):
    avg_out = jnp.mean(x, axis=1, keepdims=True)
    max_out = jnp.max(x, axis=1, keepdims=True)
    cat = jnp.concatenate([avg_out, max_out], axis=1)       # (N, 2, H, W)
    y = jax.lax.conv_general_dilated(
        cat, conv_weight,
        window_strides=(1, 1),
        padding=((PAD, PAD), (PAD, PAD)),
        dimension_numbers=("NCHW", "OIHW", "NCHW"),
    )
    return jax.nn.sigmoid(y)


if __name__ == "__main__":
    key = jax.random.PRNGKey(0)
    k_x, k_w = jax.random.split(key)

    N, C, H, W = 2, 4, 16, 16
    x = jax.random.normal(k_x, (N, C, H, W), dtype=jnp.float32)

    # Deterministic conv weight init (kaiming-uniform-like scale), (1, 2, 7, 7).
    fan_in = 2 * KSIZE * KSIZE
    bound = 1.0 / (fan_in ** 0.5)
    conv_weight = jax.random.uniform(
        k_w, (1, 2, KSIZE, KSIZE), dtype=jnp.float32, minval=-bound, maxval=bound
    )

    out = spatial_attention(x, conv_weight)
    out = jax.block_until_ready(out)

    ref = _reference(x, conv_weight)
    assert out.shape == (N, 1, H, W)
    assert jnp.allclose(out, ref, atol=2e-5, rtol=2e-5), "mismatch vs reference"

    print("KERNEL_OK")
</pallas_src>

<mosaic_0001>
module attributes {stable_mosaic.version = 11 : i64} {
  func.func @_spatial_attention_kernel(%arg0: i32, %arg1: i32, %arg2: memref<98xf32, #tpu.memory_space<smem>>, %arg3: memref<7x1x256xf32, #tpu.memory_space<vmem>>, %arg4: memref<7x1x256xf32, #tpu.memory_space<vmem>>, %arg5: memref<1x4x256xf32, #tpu.memory_space<vmem>>, %arg6: memref<1x1x256xf32, #tpu.memory_space<vmem>>, %arg7: memref<1x1x256xf32, #tpu.memory_space<vmem>>, %arg8: memref<1x1x256xf32, #tpu.memory_space<vmem>>) attributes {dimension_semantics = [#tpu.dimension_semantics<parallel>, #tpu.dimension_semantics<arbitrary>], iteration_bounds = array<i64: 2, 1>, scalar_prefetch = 0 : i64, scratch_operands = 2 : i64, tpu.core_type = #tpu.core_type<tc>, window_params = [{transform_indices = @transform_0, window_bounds = array<i64: 98>}, {pipeline_mode = #tpu.pipeline_mode<synchronous>, transform_indices = @transform_1, window_bounds = array<i64: 7, 1, 256>}, {pipeline_mode = #tpu.pipeline_mode<synchronous>, transform_indices = @transform_2, window_bounds = array<i64: 7, 1, 256>}, {transform_indices = @transform_3, window_bounds = array<i64: 1, 4, 256>}, {transform_indices = @transform_4, window_bounds = array<i64: 1, 1, 256>}]} {
    %c0_i32 = arith.constant 0 : i32
    %0 = arith.cmpi eq, %arg1, %c0_i32 : i32
    %1 = arith.extui %0 : i1 to i32
    %c0_i32_0 = arith.constant 0 : i32
    %2 = arith.cmpi ne, %1, %c0_i32_0 : i32
    scf.if %2 {
      %cst_18 = arith.constant 0.000000e+00 : f32
      %17 = vector.broadcast %cst_18 : f32 to vector<1x1x256xf32>
      %c0_19 = arith.constant 0 : index
      %c0_20 = arith.constant 0 : index
      %c0_21 = arith.constant 0 : index
      %18 = vector.load %arg7[%c0_19, %c0_20, %c0_21] : memref<1x1x256xf32, #tpu.memory_space<vmem>>, vector<1x1x256xf32>
      tpu.vector_store %arg7[%c0_19, %c0_20, %c0_21], %17 {strides = array<i32>} : memref<1x1x256xf32, #tpu.memory_space<vmem>>, vector<1x1x256xf32>,
      %cst_22 = arith.constant 0xFF800000 : f32
      %19 = vector.broadcast %cst_22 : f32 to vector<1x1x256xf32>
      %c0_23 = arith.constant 0 : index
      %c0_24 = arith.constant 0 : index
      %c0_25 = arith.constant 0 : index
      %20 = vector.load %arg8[%c0_23, %c0_24, %c0_25] : memref<1x1x256xf32, #tpu.memory_space<vmem>>, vector<1x1x256xf32>
      tpu.vector_store %arg8[%c0_23, %c0_24, %c0_25], %19 {strides = array<i32>} : memref<1x1x256xf32, #tpu.memory_space<vmem>>, vector<1x1x256xf32>,
    } else {
    }
    %c0 = arith.constant 0 : index
    %c0_1 = arith.constant 0 : index
    %c0_2 = arith.constant 0 : index
    %3 = vector.load %arg5[%c0, %c0_1, %c0_2] : memref<1x4x256xf32, #tpu.memory_space<vmem>>, vector<1x4x256xf32>
    %c0_3 = arith.constant 0 : index
    %c0_4 = arith.constant 0 : index
    %c0_5 = arith.constant 0 : index
    %4 = vector.load %arg7[%c0_3, %c0_4, %c0_5] : memref<1x1x256xf32, #tpu.memory_space<vmem>>, vector<1x1x256xf32>
    %cst = arith.constant dense<0.000000e+00> : vector<1x256xf32>
    %5 = vector.multi_reduction <add>, %3, %cst [1] : vector<1x4x256xf32> to vector<1x256xf32>
    %6 = vector.shape_cast %5 : vector<1x256xf32> to vector<1x1x256xf32>
    %7 = arith.addf %4, %6 : vector<1x1x256xf32>
    %c0_6 = arith.constant 0 : index
    %c0_7 = arith.constant 0 : index
    %c0_8 = arith.constant 0 : index
    %8 = vector.load %arg7[%c0_6, %c0_7, %c0_8] : memref<1x1x256xf32, #tpu.memory_space<vmem>>, vector<1x1x256xf32>
    tpu.vector_store %arg7[%c0_6, %c0_7, %c0_8], %7 {strides = array<i32>} : memref<1x1x256xf32, #tpu.memory_space<vmem>>, vector<1x1x256xf32>,
    %c0_9 = arith.constant 0 : index
    %c0_10 = arith.constant 0 : index
    %c0_11 = arith.constant 0 : index
    %9 = vector.load %arg8[%c0_9, %c0_10, %c0_11] : memref<1x1x256xf32, #tpu.memory_space<vmem>>, vector<1x1x256xf32>
    %cst_12 = arith.constant dense<0xFF800000> : vector<1x256xf32>
    %10 = vector.multi_reduction <maximumf>, %3, %cst_12 [1] : vector<1x4x256xf32> to vector<1x256xf32>
    %11 = vector.shape_cast %10 : vector<1x256xf32> to vector<1x1x256xf32>
    %12 = arith.maximumf %9, %11 : vector<1x1x256xf32>
    %c0_13 = arith.constant 0 : index
    %c0_14 = arith.constant 0 : index
    %c0_15 = arith.constant 0 : index
    %13 = vector.load %arg8[%c0_13, %c0_14, %c0_15] : memref<1x1x256xf32, #tpu.memory_space<vmem>>, vector<1x1x256xf32>
    tpu.vector_store %arg8[%c0_13, %c0_14, %c0_15], %12 {strides = array<i32>} : memref<1x1x256xf32, #tpu.memory_space<vmem>>, vector<1x1x256xf32>,
    %c0_i32_16 = arith.constant 0 : i32
    %14 = arith.cmpi eq, %arg1, %c0_i32_16 : i32
    %15 = arith.extui %14 : i1 to i32
    %c0_i32_17 = arith.constant 0 : i32
    %16 = arith.cmpi ne, %15, %c0_i32_17 : i32
    scf.if %16 {
      %c0_18 = arith.constant 0 : index
      %c0_19 = arith.constant 0 : index
      %c0_20 = arith.constant 0 : index
      %17 = vector.load %arg7[%c0_18, %c0_19, %c0_20] : memref<1x1x256xf32, #tpu.memory_space<vmem>>, vector<1x1x256xf32>
      %c0_21 = arith.constant 0 : index
      %c0_22 = arith.constant 0 : index
      %c0_23 = arith.constant 0 : index
      %18 = vector.load %arg8[%c0_21, %c0_22, %c0_23] : memref<1x1x256xf32, #tpu.memory_space<vmem>>, vector<1x1x256xf32>
      %c0_24 = arith.constant 0 : index
      %c0_25 = arith.constant 0 : index
      %c0_26 = arith.constant 0 : index
      %19 = vector.load %arg3[%c0_24, %c0_25, %c0_26] : memref<7x1x256xf32, #tpu.memory_space<vmem>>, vector<1x1x256xf32>
      %20 = vector.shape_cast %19 : vector<1x1x256xf32> to vector<1x256xf32>
      %c48_i32 = arith.constant 48 : i32
      %21 = tpu.dynamic_rotate %17 by %c48_i32 dim 2 : vector<1x1x256xf32>, i32 -> vector<1x1x256xf32>
      %22 = vector.shape_cast %20 : vector<1x256xf32> to vector<1x1x256xf32>
      %23 = arith.mulf %21, %22 : vector<1x1x256xf32>
      %c0_27 = arith.constant 0 : index
      %24 = memref.load %arg2[%c0_27] : memref<98xf32, #tpu.memory_space<smem>>
      %25 = vector.broadcast %24 : f32 to vector<1x1x256xf32>
      %26 = arith.mulf %25, %23 : vector<1x1x256xf32>
      %c1 = arith.constant 1 : index
      %27 = memref.load %arg2[%c1] : memref<98xf32, #tpu.memory_space<smem>>
      %28 = vector.broadcast %27 : f32 to vector<1x1x256xf32>
      %29 = arith.mulf %28, %23 : vector<1x1x256xf32>
      %c2 = arith.constant 2 : index
      %30 = memref.load %arg2[%c2] : memref<98xf32, #tpu.memory_space<smem>>
      %31 = vector.broadcast %30 : f32 to vector<1x1x256xf32>
      %32 = arith.mulf %31, %23 : vector<1x1x256xf32>
      %c3 = arith.constant 3 : index
      %33 = memref.load %arg2[%c3] : memref<98xf32, #tpu.memory_space<smem>>
      %34 = vector.broadcast %33 : f32 to vector<1x1x256xf32>
      %35 = arith.mulf %34, %23 : vector<1x1x256xf32>
      %c4 = arith.constant 4 : index
      %36 = memref.load %arg2[%c4] : memref<98xf32, #tpu.memory_space<smem>>
      %37 = vector.broadcast %36 : f32 to vector<1x1x256xf32>
      %38 = arith.mulf %37, %23 : vector<1x1x256xf32>
      %c5 = arith.constant 5 : index
      %39 = memref.load %arg2[%c5] : memref<98xf32, #tpu.memory_space<smem>>
      %40 = vector.broadcast %39 : f32 to vector<1x1x256xf32>
      %41 = arith.mulf %40, %23 : vector<1x1x256xf32>
      %c6 = arith.constant 6 : index
      %42 = memref.load %arg2[%c6] : memref<98xf32, #tpu.memory_space<smem>>
      %43 = vector.broadcast %42 : f32 to vector<1x1x256xf32>
      %44 = arith.mulf %43, %23 : vector<1x1x256xf32>
      %c48_i32_28 = arith.constant 48 : i32
      %45 = tpu.dynamic_rotate %18 by %c48_i32_28 dim 2 : vector<1x1x256xf32>, i32 -> vector<1x1x256xf32>
      %46 = vector.shape_cast %20 : vector<1x256xf32> to vector<1x1x256xf32>
      %47 = arith.mulf %45, %46 : vector<1x1x256xf32>
      %c49 = arith.constant 49 : index
      %48 = memref.load %arg2[%c49] : memref<98xf32, #tpu.memory_space<smem>>
      %49 = vector.broadcast %48 : f32 to vector<1x1x256xf32>
      %50 = arith.mulf %49, %47 : vector<1x1x256xf32>
      %51 = arith.addf %26, %50 : vector<1x1x256xf32>
      %c50 = arith.constant 50 : index
      %52 = memref.load %arg2[%c50] : memref<98xf32, #tpu.memory_space<smem>>
      %53 = vector.broadcast %52 : f32 to vector<1x1x256xf32>
      %54 = arith.mulf %53, %47 : vector<1x1x256xf32>
      %55 = arith.addf %29, %54 : vector<1x1x256xf32>
      %c51 = arith.constant 51 : index
      %56 = memref.load %arg2[%c51] : memref<98xf32, #tpu.memory_space<smem>>
      %57 = vector.broadcast %56 : f32 to vector<1x1x256xf32>
      %58 = arith.mulf %57, %47 : vector<1x1x256xf32>
      %59 = arith.addf %32, %58 : vector<1x1x256xf32>
      %c52 = arith.constant 52 : index
      %60 = memref.load %arg2[%c52] : memref<98xf32, #tpu.memory_space<smem>>
      %61 = vector.broadcast %60 : f32 to vector<1x1x256xf32>
      %62 = arith.mulf %61, %47 : vector<1x1x256xf32>
      %63 = arith.addf %35, %62 : vector<1x1x256xf32>
      %c53 = arith.constant 53 : index
      %64 = memref.load %arg2[%c53] : memref<98xf32, #tpu.memory_space<smem>>
      %65 = vector.broadcast %64 : f32 to vector<1x1x256xf32>
      %66 = arith.mulf %65, %47 : vector<1x1x256xf32>
      %67 = arith.addf %38, %66 : vector<1x1x256xf32>
      %c54 = arith.constant 54 : index
      %68 = memref.load %arg2[%c54] : memref<98xf32, #tpu.memory_space<smem>>
      %69 = vector.broadcast %68 : f32 to vector<1x1x256xf32>
      %70 = arith.mulf %69, %47 : vector<1x1x256xf32>
      %71 = arith.addf %41, %70 : vector<1x1x256xf32>
      %c55 = arith.constant 55 : index
      %72 = memref.load %arg2[%c55] : memref<98xf32, #tpu.memory_space<smem>>
      %73 = vector.broadcast %72 : f32 to vector<1x1x256xf32>
      %74 = arith.mulf %73, %47 : vector<1x1x256xf32>
      %75 = arith.addf %44, %74 : vector<1x1x256xf32>
      %c1_29 = arith.constant 1 : index
      %c0_30 = arith.constant 0 : index
      %c0_31 = arith.constant 0 : index
      %76 = vector.load %arg3[%c1_29, %c0_30, %c0_31] : memref<7x1x256xf32, #tpu.memory_space<vmem>>, vector<1x1x256xf32>
      %77 = vector.shape_cast %76 : vector<1x1x256xf32> to vector<1x256xf32>
      %c32_i32 = arith.constant 32 : i32
      %78 = tpu.dynamic_rotate %17 by %c32_i32 dim 2 : vector<1x1x256xf32>, i32 -> vector<1x1x256xf32>
      %79 = vector.shape_cast %77 : vector<1x256xf32> to vector<1x1x256xf32>
      %80 = arith.mulf %78, %79 : vector<1x1x256xf32>
      %c7 = arith.constant 7 : index
      %81 = memref.load %arg2[%c7] : memref<98xf32, #tpu.memory_space<smem>>
      %82 = vector.broadcast %81 : f32 to vector<1x1x256xf32>
      %83 = arith.mulf %82, %80 : vector<1x1x256xf32>
      %84 = arith.addf %51, %83 : vector<1x1x256xf32>
      %c8 = arith.constant 8 : index
      %85 = memref.load %arg2[%c8] : memref<98xf32, #tpu.memory_space<smem>>
      %86 = vector.broadcast %85 : f32 to vector<1x1x256xf32>
      %87 = arith.mulf %86, %80 : vector<1x1x256xf32>
      %88 = arith.addf %55, %87 : vector<1x1x256xf32>
      %c9 = arith.constant 9 : index
      %89 = memref.load %arg2[%c9] : memref<98xf32, #tpu.memory_space<smem>>
      %90 = vector.broadcast %89 : f32 to vector<1x1x256xf32>
      %91 = arith.mulf %90, %80 : vector<1x1x256xf32>
      %92 = arith.addf %59, %91 : vector<1x1x256xf32>
      %c10 = arith.constant 10 : index
      %93 = memref.load %arg2[%c10] : memref<98xf32, #tpu.memory_space<smem>>
      %94 = vector.broadcast %93 : f32 to vector<1x1x256xf32>
      %95 = arith.mulf %94, %80 : vector<1x1x256xf32>
      %96 = arith.addf %63, %95 : vector<1x1x256xf32>
      %c11 = arith.constant 11 : index
      %97 = memref.load %arg2[%c11] : memref<98xf32, #tpu.memory_space<smem>>
      %98 = vector.broadcast %97 : f32 to vector<1x1x256xf32>
      %99 = arith.mulf %98, %80 : vector<1x1x256xf32>
      %100 = arith.addf %67, %99 : vector<1x1x256xf32>
      %c12 = arith.constant 12 : index
      %101 = memref.load %arg2[%c12] : memref<98xf32, #tpu.memory_space<smem>>
      %102 = vector.broadcast %101 : f32 to vector<1x1x256xf32>
      %103 = arith.mulf %102, %80 : vector<1x1x256xf32>
      %104 = arith.addf %71, %103 : vector<1x1x256xf32>
      %c13 = arith.constant 13 : index
      %105 = memref.load %arg2[%c13] : memref<98xf32, #tpu.memory_space<smem>>
      %106 = vector.broadcast %105 : f32 to vector<1x1x256xf32>
      %107 = arith.mulf %106, %80 : vector<1x1x256xf32>
      %108 = arith.addf %75, %107 : vector<1x1x256xf32>
      %c32_i32_32 = arith.constant 32 : i32
      %109 = tpu.dynamic_rotate %18 by %c32_i32_32 dim 2 : vector<1x1x256xf32>, i32 -> vector<1x1x256xf32>
      %110 = vector.shape_cast %77 : vector<1x256xf32> to vector<1x1x256xf32>
      %111 = arith.mulf %109, %110 : vector<1x1x256xf32>
      %c56 = arith.constant 56 : index
      %112 = memref.load %arg2[%c56] : memref<98xf32, #tpu.memory_space<smem>>
      %113 = vector.broadcast %112 : f32 to vector<1x1x256xf32>
      %114 = arith.mulf %113, %111 : vector<1x1x256xf32>
      %115 = arith.addf %84, %114 : vector<1x1x256xf32>
      %c57 = arith.constant 57 : index
      %116 = memref.load %arg2[%c57] : memref<98xf32, #tpu.memory_space<smem>>
      %117 = vector.broadcast %116 : f32 to vector<1x1x256xf32>
      %118 = arith.mulf %117, %111 : vector<1x1x256xf32>
      %119 = arith.addf %88, %118 : vector<1x1x256xf32>
      %c58 = arith.constant 58 : index
      %120 = memref.load %arg2[%c58] : memref<98xf32, #tpu.memory_space<smem>>
      %121 = vector.broadcast %120 : f32 to vector<1x1x256xf32>
      %122 = arith.mulf %121, %111 : vector<1x1x256xf32>
      %123 = arith.addf %92, %122 : vector<1x1x256xf32>
      %c59 = arith.constant 59 : index
      %124 = memref.load %arg2[%c59] : memref<98xf32, #tpu.memory_space<smem>>
      %125 = vector.broadcast %124 : f32 to vector<1x1x256xf32>
      %126 = arith.mulf %125, %111 : vector<1x1x256xf32>
      %127 = arith.addf %96, %126 : vector<1x1x256xf32>
      %c60 = arith.constant 60 : index
      %128 = memref.load %arg2[%c60] : memref<98xf32, #tpu.memory_space<smem>>
      %129 = vector.broadcast %128 : f32 to vector<1x1x256xf32>
      %130 = arith.mulf %129, %111 : vector<1x1x256xf32>
      %131 = arith.addf %100, %130 : vector<1x1x256xf32>
      %c61 = arith.constant 61 : index
      %132 = memref.load %arg2[%c61] : memref<98xf32, #tpu.memory_space<smem>>
      %133 = vector.broadcast %132 : f32 to vector<1x1x256xf32>
      %134 = arith.mulf %133, %111 : vector<1x1x256xf32>
      %135 = arith.addf %104, %134 : vector<1x1x256xf32>
      %c62 = arith.constant 62 : index
      %136 = memref.load %arg2[%c62] : memref<98xf32, #tpu.memory_space<smem>>
      %137 = vector.broadcast %136 : f32 to vector<1x1x256xf32>
      %138 = arith.mulf %137, %111 : vector<1x1x256xf32>
      %139 = arith.addf %108, %138 : vector<1x1x256xf32>
      %c2_33 = arith.constant 2 : index
      %c0_34 = arith.constant 0 : index
      %c0_35 = arith.constant 0 : index
      %140 = vector.load %arg3[%c2_33, %c0_34, %c0_35] : memref<7x1x256xf32, #tpu.memory_space<vmem>>, vector<1x1x256xf32>
      %141 = vector.shape_cast %140 : vector<1x1x256xf32> to vector<1x256xf32>
      %c16_i32 = arith.constant 16 : i32
      %142 = tpu.dynamic_rotate %17 by %c16_i32 dim 2 : vector<1x1x256xf32>, i32 -> vector<1x1x256xf32>
      %143 = vector.shape_cast %141 : vector<1x256xf32> to vector<1x1x256xf32>
      %144 = arith.mulf %142, %143 : vector<1x1x256xf32>
      %c14 = arith.constant 14 : index
      %145 = memref.load %arg2[%c14] : memref<98xf32, #tpu.memory_space<smem>>
      %146 = vector.broadcast %145 : f32 to vector<1x1x256xf32>
      %147 = arith.mulf %146, %144 : vector<1x1x256xf32>
      %148 = arith.addf %115, %147 : vector<1x1x256xf32>
      %c15 = arith.constant 15 : index
      %149 = memref.load %arg2[%c15] : memref<98xf32, #tpu.memory_space<smem>>
      %150 = vector.broadcast %149 : f32 to vector<1x1x256xf32>
      %151 = arith.mulf %150, %144 : vector<1x1x256xf32>
      %152 = arith.addf %119, %151 : vector<1x1x256xf32>
      %c16 = arith.constant 16 : index
      %153 = memref.load %arg2[%c16] : memref<98xf32, #tpu.memory_space<smem>>
      %154 = vector.broadcast %153 : f32 to vector<1x1x256xf32>
      %155 = arith.mulf %154, %144 : vector<1x1x256xf32>
      %156 = arith.addf %123, %155 : vector<1x1x256xf32>
      %c17 = arith.constant 17 : index
      %157 = memref.load %arg2[%c17] : memref<98xf32, #tpu.memory_space<smem>>
      %158 = vector.broadcast %157 : f32 to vector<1x1x256xf32>
      %159 = arith.mulf %158, %144 : vector<1x1x256xf32>
      %160 = arith.addf %127, %159 : vector<1x1x256xf32>
      %c18 = arith.constant 18 : index
      %161 = memref.load %arg2[%c18] : memref<98xf32, #tpu.memory_space<smem>>
      %162 = vector.broadcast %161 : f32 to vector<1x1x256xf32>
      %163 = arith.mulf %162, %144 : vector<1x1x256xf32>
      %164 = arith.addf %131, %163 : vector<1x1x256xf32>
      %c19 = arith.constant 19 : index
      %165 = memref.load %arg2[%c19] : memref<98xf32, #tpu.memory_space<smem>>
      %166 = vector.broadcast %165 : f32 to vector<1x1x256xf32>
      %167 = arith.mulf %166, %144 : vector<1x1x256xf32>
      %168 = arith.addf %135, %167 : vector<1x1x256xf32>
      %c20 = arith.constant 20 : index
      %169 = memref.load %arg2[%c20] : memref<98xf32, #tpu.memory_space<smem>>
      %170 = vector.broadcast %169 : f32 to vector<1x1x256xf32>
      %171 = arith.mulf %170, %144 : vector<1x1x256xf32>
      %172 = arith.addf %139, %171 : vector<1x1x256xf32>
      %c16_i32_36 = arith.constant 16 : i32
      %173 = tpu.dynamic_rotate %18 by %c16_i32_36 dim 2 : vector<1x1x256xf32>, i32 -> vector<1x1x256xf32>
      %174 = vector.shape_cast %141 : vector<1x256xf32> to vector<1x1x256xf32>
      %175 = arith.mulf %173, %174 : vector<1x1x256xf32>
      %c63 = arith.constant 63 : index
      %176 = memref.load %arg2[%c63] : memref<98xf32, #tpu.memory_space<smem>>
      %177 = vector.broadcast %176 : f32 to vector<1x1x256xf32>
      %178 = arith.mulf %177, %175 : vector<1x1x256xf32>
      %179 = arith.addf %148, %178 : vector<1x1x256xf32>
      %c64 = arith.constant 64 : index
      %180 = memref.load %arg2[%c64] : memref<98xf32, #tpu.memory_space<smem>>
      %181 = vector.broadcast %180 : f32 to vector<1x1x256xf32>
      %182 = arith.mulf %181, %175 : vector<1x1x256xf32>
      %183 = arith.addf %152, %182 : vector<1x1x256xf32>
      %c65 = arith.constant 65 : index
      %184 = memref.load %arg2[%c65] : memref<98xf32, #tpu.memory_space<smem>>
      %185 = vector.broadcast %184 : f32 to vector<1x1x256xf32>
      %186 = arith.mulf %185, %175 : vector<1x1x256xf32>
      %187 = arith.addf %156, %186 : vector<1x1x256xf32>
      %c66 = arith.constant 66 : index
      %188 = memref.load %arg2[%c66] : memref<98xf32, #tpu.memory_space<smem>>
      %189 = vector.broadcast %188 : f32 to vector<1x1x256xf32>
      %190 = arith.mulf %189, %175 : vector<1x1x256xf32>
      %191 = arith.addf %160, %190 : vector<1x1x256xf32>
      %c67 = arith.constant 67 : index
      %192 = memref.load %arg2[%c67] : memref<98xf32, #tpu.memory_space<smem>>
      %193 = vector.broadcast %192 : f32 to vector<1x1x256xf32>
      %194 = arith.mulf %193, %175 : vector<1x1x256xf32>
      %195 = arith.addf %164, %194 : vector<1x1x256xf32>
      %c68 = arith.constant 68 : index
      %196 = memref.load %arg2[%c68] : memref<98xf32, #tpu.memory_space<smem>>
      %197 = vector.broadcast %196 : f32 to vector<1x1x256xf32>
      %198 = arith.mulf %197, %175 : vector<1x1x256xf32>
      %199 = arith.addf %168, %198 : vector<1x1x256xf32>
      %c69 = arith.constant 69 : index
      %200 = memref.load %arg2[%c69] : memref<98xf32, #tpu.memory_space<smem>>
      %201 = vector.broadcast %200 : f32 to vector<1x1x256xf32>
      %202 = arith.mulf %201, %175 : vector<1x1x256xf32>
      %203 = arith.addf %172, %202 : vector<1x1x256xf32>
      %c21 = arith.constant 21 : index
      %204 = memref.load %arg2[%c21] : memref<98xf32, #tpu.memory_space<smem>>
      %205 = vector.broadcast %204 : f32 to vector<1x1x256xf32>
      %206 = arith.mulf %205, %17 : vector<1x1x256xf32>
      %207 = arith.addf %179, %206 : vector<1x1x256xf32>
      %c22 = arith.constant 22 : index
      %208 = memref.load %arg2[%c22] : memref<98xf32, #tpu.memory_space<smem>>
      %209 = vector.broadcast %208 : f32 to vector<1x1x256xf32>
      %210 = arith.mulf %209, %17 : vector<1x1x256xf32>
      %211 = arith.addf %183, %210 : vector<1x1x256xf32>
      %c23 = arith.constant 23 : index
      %212 = memref.load %arg2[%c23] : memref<98xf32, #tpu.memory_space<smem>>
      %213 = vector.broadcast %212 : f32 to vector<1x1x256xf32>
      %214 = arith.mulf %213, %17 : vector<1x1x256xf32>
      %215 = arith.addf %187, %214 : vector<1x1x256xf32>
      %c24 = arith.constant 24 : index
      %216 = memref.load %arg2[%c24] : memref<98xf32, #tpu.memory_space<smem>>
      %217 = vector.broadcast %216 : f32 to vector<1x1x256xf32>
      %218 = arith.mulf %217, %17 : vector<1x1x256xf32>
      %219 = arith.addf %191, %218 : vector<1x1x256xf32>
      %c25 = arith.constant 25 : index
      %220 = memref.load %arg2[%c25] : memref<98xf32, #tpu.memory_space<smem>>
      %221 = vector.broadcast %220 : f32 to vector<1x1x256xf32>
      %222 = arith.mulf %221, %17 : vector<1x1x256xf32>
      %223 = arith.addf %195, %222 : vector<1x1x256xf32>
      %c26 = arith.constant 26 : index
      %224 = memref.load %arg2[%c26] : memref<98xf32, #tpu.memory_space<smem>>
      %225 = vector.broadcast %224 : f32 to vector<1x1x256xf32>
      %226 = arith.mulf %225, %17 : vector<1x1x256xf32>
      %227 = arith.addf %199, %226 : vector<1x1x256xf32>
      %c27 = arith.constant 27 : index
      %228 = memref.load %arg2[%c27] : memref<98xf32, #tpu.memory_space<smem>>
      %229 = vector.broadcast %228 : f32 to vector<1x1x256xf32>
      %230 = arith.mulf %229, %17 : vector<1x1x256xf32>
      %231 = arith.addf %203, %230 : vector<1x1x256xf32>
      %c70 = arith.constant 70 : index
      %232 = memref.load %arg2[%c70] : memref<98xf32, #tpu.memory_space<smem>>
      %233 = vector.broadcast %232 : f32 to vector<1x1x256xf32>
      %234 = arith.mulf %233, %18 : vector<1x1x256xf32>
      %235 = arith.addf %207, %234 : vector<1x1x256xf32>
      %c71 = arith.constant 71 : index
      %236 = memref.load %arg2[%c71] : memref<98xf32, #tpu.memory_space<smem>>
      %237 = vector.broadcast %236 : f32 to vector<1x1x256xf32>
      %238 = arith.mulf %237, %18 : vector<1x1x256xf32>
      %239 = arith.addf %211, %238 : vector<1x1x256xf32>
      %c72 = arith.constant 72 : index
      %240 = memref.load %arg2[%c72] : memref<98xf32, #tpu.memory_space<smem>>
      %241 = vector.broadcast %240 : f32 to vector<1x1x256xf32>
      %242 = arith.mulf %241, %18 : vector<1x1x256xf32>
      %243 = arith.addf %215, %242 : vector<1x1x256xf32>
      %c73 = arith.constant 73 : index
      %244 = memref.load %arg2[%c73] : memref<98xf32, #tpu.memory_space<smem>>
      %245 = vector.broadcast %244 : f32 to vector<1x1x256xf32>
      %246 = arith.mulf %245, %18 : vector<1x1x256xf32>
      %247 = arith.addf %219, %246 : vector<1x1x256xf32>
      %c74 = arith.constant 74 : index
      %248 = memref.load %arg2[%c74] : memref<98xf32, #tpu.memory_space<smem>>
      %249 = vector.broadcast %248 : f32 to vector<1x1x256xf32>
      %250 = arith.mulf %249, %18 : vector<1x1x256xf32>
      %251 = arith.addf %223, %250 : vector<1x1x256xf32>
      %c75 = arith.constant 75 : index
      %252 = memref.load %arg2[%c75] : memref<98xf32, #tpu.memory_space<smem>>
      %253 = vector.broadcast %252 : f32 to vector<1x1x256xf32>
      %254 = arith.mulf %253, %18 : vector<1x1x256xf32>
      %255 = arith.addf %227, %254 : vector<1x1x256xf32>
      %c76 = arith.constant 76 : index
      %256 = memref.load %arg2[%c76] : memref<98xf32, #tpu.memory_space<smem>>
      %257 = vector.broadcast %256 : f32 to vector<1x1x256xf32>
      %258 = arith.mulf %257, %18 : vector<1x1x256xf32>
      %259 = arith.addf %231, %258 : vector<1x1x256xf32>
      %c4_37 = arith.constant 4 : index
      %c0_38 = arith.constant 0 : index
      %c0_39 = arith.constant 0 : index
      %260 = vector.load %arg3[%c4_37, %c0_38, %c0_39] : memref<7x1x256xf32, #tpu.memory_space<vmem>>, vector<1x1x256xf32>
      %261 = vector.shape_cast %260 : vector<1x1x256xf32> to vector<1x256xf32>
      %c240_i32 = arith.constant 240 : i32
      %262 = tpu.dynamic_rotate %17 by %c240_i32 dim 2 : vector<1x1x256xf32>, i32 -> vector<1x1x256xf32>
      %263 = vector.shape_cast %261 : vector<1x256xf32> to vector<1x1x256xf32>
      %264 = arith.mulf %262, %263 : vector<1x1x256xf32>
      %c28 = arith.constant 28 : index
      %265 = memref.load %arg2[%c28] : memref<98xf32, #tpu.memory_space<smem>>
      %266 = vector.broadcast %265 : f32 to vector<1x1x256xf32>
      %267 = arith.mulf %266, %264 : vector<1x1x256xf32>
      %268 = arith.addf %235, %267 : vector<1x1x256xf32>
      %c29 = arith.constant 29 : index
      %269 = memref.load %arg2[%c29] : memref<98xf32, #tpu.memory_space<smem>>
      %270 = vector.broadcast %269 : f32 to vector<1x1x256xf32>
      %271 = arith.mulf %270, %264 : vector<1x1x256xf32>
      %272 = arith.addf %239, %271 : vector<1x1x256xf32>
      %c30 = arith.constant 30 : index
      %273 = memref.load %arg2[%c30] : memref<98xf32, #tpu.memory_space<smem>>
      %274 = vector.broadcast %273 : f32 to vector<1x1x256xf32>
      %275 = arith.mulf %274, %264 : vector<1x1x256xf32>
      %276 = arith.addf %243, %275 : vector<1x1x256xf32>
      %c31 = arith.constant 31 : index
      %277 = memref.load %arg2[%c31] : memref<98xf32, #tpu.memory_space<smem>>
      %278 = vector.broadcast %277 : f32 to vector<1x1x256xf32>
      %279 = arith.mulf %278, %264 : vector<1x1x256xf32>
      %280 = arith.addf %247, %279 : vector<1x1x256xf32>
      %c32 = arith.constant 32 : index
      %281 = memref.load %arg2[%c32] : memref<98xf32, #tpu.memory_space<smem>>
      %282 = vector.broadcast %281 : f32 to vector<1x1x256xf32>
      %283 = arith.mulf %282, %264 : vector<1x1x256xf32>
      %284 = arith.addf %251, %283 : vector<1x1x256xf32>
      %c33 = arith.constant 33 : index
      %285 = memref.load %arg2[%c33] : memref<98xf32, #tpu.memory_space<smem>>
      %286 = vector.broadcast %285 : f32 to vector<1x1x256xf32>
      %287 = arith.mulf %286, %264 : vector<1x1x256xf32>
      %288 = arith.addf %255, %287 : vector<1x1x256xf32>
      %c34 = arith.constant 34 : index
      %289 = memref.load %arg2[%c34] : memref<98xf32, #tpu.memory_space<smem>>
      %290 = vector.broadcast %289 : f32 to vector<1x1x256xf32>
      %291 = arith.mulf %290, %264 : vector<1x1x256xf32>
      %292 = arith.addf %259, %291 : vector<1x1x256xf32>
      %c240_i32_40 = arith.constant 240 : i32
      %293 = tpu.dynamic_rotate %18 by %c240_i32_40 dim 2 : vector<1x1x256xf32>, i32 -> vector<1x1x256xf32>
      %294 = vector.shape_cast %261 : vector<1x256xf32> to vector<1x1x256xf32>
      %295 = arith.mulf %293, %294 : vector<1x1x256xf32>
      %c77 = arith.constant 77 : index
      %296 = memref.load %arg2[%c77] : memref<98xf32, #tpu.memory_space<smem>>
      %297 = vector.broadcast %296 : f32 to vector<1x1x256xf32>
      %298 = arith.mulf %297, %295 : vector<1x1x256xf32>
      %299 = arith.addf %268, %298 : vector<1x1x256xf32>
      %c78 = arith.constant 78 : index
      %300 = memref.load %arg2[%c78] : memref<98xf32, #tpu.memory_space<smem>>
      %301 = vector.broadcast %300 : f32 to vector<1x1x256xf32>
      %302 = arith.mulf %301, %295 : vector<1x1x256xf32>
      %303 = arith.addf %272, %302 : vector<1x1x256xf32>
      %c79 = arith.constant 79 : index
      %304 = memref.load %arg2[%c79] : memref<98xf32, #tpu.memory_space<smem>>
      %305 = vector.broadcast %304 : f32 to vector<1x1x256xf32>
      %306 = arith.mulf %305, %295 : vector<1x1x256xf32>
      %307 = arith.addf %276, %306 : vector<1x1x256xf32>
      %c80 = arith.constant 80 : index
      %308 = memref.load %arg2[%c80] : memref<98xf32, #tpu.memory_space<smem>>
      %309 = vector.broadcast %308 : f32 to vector<1x1x256xf32>
      %310 = arith.mulf %309, %295 : vector<1x1x256xf32>
      %311 = arith.addf %280, %310 : vector<1x1x256xf32>
      %c81 = arith.constant 81 : index
      %312 = memref.load %arg2[%c81] : memref<98xf32, #tpu.memory_space<smem>>
      %313 = vector.broadcast %312 : f32 to vector<1x1x256xf32>
      %314 = arith.mulf %313, %295 : vector<1x1x256xf32>
      %315 = arith.addf %284, %314 : vector<1x1x256xf32>
      %c82 = arith.constant 82 : index
      %316 = memref.load %arg2[%c82] : memref<98xf32, #tpu.memory_space<smem>>
      %317 = vector.broadcast %316 : f32 to vector<1x1x256xf32>
      %318 = arith.mulf %317, %295 : vector<1x1x256xf32>
      %319 = arith.addf %288, %318 : vector<1x1x256xf32>
      %c83 = arith.constant 83 : index
      %320 = memref.load %arg2[%c83] : memref<98xf32, #tpu.memory_space<smem>>
      %321 = vector.broadcast %320 : f32 to vector<1x1x256xf32>
      %322 = arith.mulf %321, %295 : vector<1x1x256xf32>
      %323 = arith.addf %292, %322 : vector<1x1x256xf32>
      %c5_41 = arith.constant 5 : index
      %c0_42 = arith.constant 0 : index
      %c0_43 = arith.constant 0 : index
      %324 = vector.load %arg3[%c5_41, %c0_42, %c0_43] : memref<7x1x256xf32, #tpu.memory_space<vmem>>, vector<1x1x256xf32>
      %325 = vector.shape_cast %324 : vector<1x1x256xf32> to vector<1x256xf32>
      %c224_i32 = arith.constant 224 : i32
      %326 = tpu.dynamic_rotate %17 by %c224_i32 dim 2 : vector<1x1x256xf32>, i32 -> vector<1x1x256xf32>
      %327 = vector.shape_cast %325 : vector<1x256xf32> to vector<1x1x256xf32>
      %328 = arith.mulf %326, %327 : vector<1x1x256xf32>
      %c35 = arith.constant 35 : index
      %329 = memref.load %arg2[%c35] : memref<98xf32, #tpu.memory_space<smem>>
      %330 = vector.broadcast %329 : f32 to vector<1x1x256xf32>
      %331 = arith.mulf %330, %328 : vector<1x1x256xf32>
      %332 = arith.addf %299, %331 : vector<1x1x256xf32>
      %c36 = arith.constant 36 : index
      %333 = memref.load %arg2[%c36] : memref<98xf32, #tpu.memory_space<smem>>
      %334 = vector.broadcast %333 : f32 to vector<1x1x256xf32>
      %335 = arith.mulf %334, %328 : vector<1x1x256xf32>
      %336 = arith.addf %303, %335 : vector<1x1x256xf32>
      %c37 = arith.constant 37 : index
      %337 = memref.load %arg2[%c37] : memref<98xf32, #tpu.memory_space<smem>>
      %338 = vector.broadcast %337 : f32 to vector<1x1x256xf32>
      %339 = arith.mulf %338, %328 : vector<1x1x256xf32>
      %340 = arith.addf %307, %339 : vector<1x1x256xf32>
      %c38 = arith.constant 38 : index
      %341 = memref.load %arg2[%c38] : memref<98xf32, #tpu.memory_space<smem>>
      %342 = vector.broadcast %341 : f32 to vector<1x1x256xf32>
      %343 = arith.mulf %342, %328 : vector<1x1x256xf32>
      %344 = arith.addf %311, %343 : vector<1x1x256xf32>
      %c39 = arith.constant 39 : index
      %345 = memref.load %arg2[%c39] : memref<98xf32, #tpu.memory_space<smem>>
      %346 = vector.broadcast %345 : f32 to vector<1x1x256xf32>
      %347 = arith.mulf %346, %328 : vector<1x1x256xf32>
      %348 = arith.addf %315, %347 : vector<1x1x256xf32>
      %c40 = arith.constant 40 : index
      %349 = memref.load %arg2[%c40] : memref<98xf32, #tpu.memory_space<smem>>
      %350 = vector.broadcast %349 : f32 to vector<1x1x256xf32>
      %351 = arith.mulf %350, %328 : vector<1x1x256xf32>
      %352 = arith.addf %319, %351 : vector<1x1x256xf32>
      %c41 = arith.constant 41 : index
      %353 = memref.load %arg2[%c41] : memref<98xf32, #tpu.memory_space<smem>>
      %354 = vector.broadcast %353 : f32 to vector<1x1x256xf32>
      %355 = arith.mulf %354, %328 : vector<1x1x256xf32>
      %356 = arith.addf %323, %355 : vector<1x1x256xf32>
      %c224_i32_44 = arith.constant 224 : i32
      %357 = tpu.dynamic_rotate %18 by %c224_i32_44 dim 2 : vector<1x1x256xf32>, i32 -> vector<1x1x256xf32>
      %358 = vector.shape_cast %325 : vector<1x256xf32> to vector<1x1x256xf32>
      %359 = arith.mulf %357, %358 : vector<1x1x256xf32>
      %c84 = arith.constant 84 : index
      %360 = memref.load %arg2[%c84] : memref<98xf32, #tpu.memory_space<smem>>
      %361 = vector.broadcast %360 : f32 to vector<1x1x256xf32>
      %362 = arith.mulf %361, %359 : vector<1x1x256xf32>
      %363 = arith.addf %332, %362 : vector<1x1x256xf32>
      %c85 = arith.constant 85 : index
      %364 = memref.load %arg2[%c85] : memref<98xf32, #tpu.memory_space<smem>>
      %365 = vector.broadcast %364 : f32 to vector<1x1x256xf32>
      %366 = arith.mulf %365, %359 : vector<1x1x256xf32>
      %367 = arith.addf %336, %366 : vector<1x1x256xf32>
      %c86 = arith.constant 86 : index
      %368 = memref.load %arg2[%c86] : memref<98xf32, #tpu.memory_space<smem>>
      %369 = vector.broadcast %368 : f32 to vector<1x1x256xf32>
      %370 = arith.mulf %369, %359 : vector<1x1x256xf32>
      %371 = arith.addf %340, %370 : vector<1x1x256xf32>
      %c87 = arith.constant 87 : index
      %372 = memref.load %arg2[%c87] : memref<98xf32, #tpu.memory_space<smem>>
      %373 = vector.broadcast %372 : f32 to vector<1x1x256xf32>
      %374 = arith.mulf %373, %359 : vector<1x1x256xf32>
      %375 = arith.addf %344, %374 : vector<1x1x256xf32>
      %c88 = arith.constant 88 : index
      %376 = memref.load %arg2[%c88] : memref<98xf32, #tpu.memory_space<smem>>
      %377 = vector.broadcast %376 : f32 to vector<1x1x256xf32>
      %378 = arith.mulf %377, %359 : vector<1x1x256xf32>
      %379 = arith.addf %348, %378 : vector<1x1x256xf32>
      %c89 = arith.constant 89 : index
      %380 = memref.load %arg2[%c89] : memref<98xf32, #tpu.memory_space<smem>>
      %381 = vector.broadcast %380 : f32 to vector<1x1x256xf32>
      %382 = arith.mulf %381, %359 : vector<1x1x256xf32>
      %383 = arith.addf %352, %382 : vector<1x1x256xf32>
      %c90 = arith.constant 90 : index
      %384 = memref.load %arg2[%c90] : memref<98xf32, #tpu.memory_space<smem>>
      %385 = vector.broadcast %384 : f32 to vector<1x1x256xf32>
      %386 = arith.mulf %385, %359 : vector<1x1x256xf32>
      %387 = arith.addf %356, %386 : vector<1x1x256xf32>
      %c6_45 = arith.constant 6 : index
      %c0_46 = arith.constant 0 : index
      %c0_47 = arith.constant 0 : index
      %388 = vector.load %arg3[%c6_45, %c0_46, %c0_47] : memref<7x1x256xf32, #tpu.memory_space<vmem>>, vector<1x1x256xf32>
      %389 = vector.shape_cast %388 : vector<1x1x256xf32> to vector<1x256xf32>
      %c208_i32 = arith.constant 208 : i32
      %390 = tpu.dynamic_rotate %17 by %c208_i32 dim 2 : vector<1x1x256xf32>, i32 -> vector<1x1x256xf32>
      %391 = vector.shape_cast %389 : vector<1x256xf32> to vector<1x1x256xf32>
      %392 = arith.mulf %390, %391 : vector<1x1x256xf32>
      %c42 = arith.constant 42 : index
      %393 = memref.load %arg2[%c42] : memref<98xf32, #tpu.memory_space<smem>>
      %394 = vector.broadcast %393 : f32 to vector<1x1x256xf32>
      %395 = arith.mulf %394, %392 : vector<1x1x256xf32>
      %396 = arith.addf %363, %395 : vector<1x1x256xf32>
      %c43 = arith.constant 43 : index
      %397 = memref.load %arg2[%c43] : memref<98xf32, #tpu.memory_space<smem>>
      %398 = vector.broadcast %397 : f32 to vector<1x1x256xf32>
      %399 = arith.mulf %398, %392 : vector<1x1x256xf32>
      %400 = arith.addf %367, %399 : vector<1x1x256xf32>
      %c44 = arith.constant 44 : index
      %401 = memref.load %arg2[%c44] : memref<98xf32, #tpu.memory_space<smem>>
      %402 = vector.broadcast %401 : f32 to vector<1x1x256xf32>
      %403 = arith.mulf %402, %392 : vector<1x1x256xf32>
      %404 = arith.addf %371, %403 : vector<1x1x256xf32>
      %c45 = arith.constant 45 : index
      %405 = memref.load %arg2[%c45] : memref<98xf32, #tpu.memory_space<smem>>
      %406 = vector.broadcast %405 : f32 to vector<1x1x256xf32>
      %407 = arith.mulf %406, %392 : vector<1x1x256xf32>
      %408 = arith.addf %375, %407 : vector<1x1x256xf32>
      %c46 = arith.constant 46 : index
      %409 = memref.load %arg2[%c46] : memref<98xf32, #tpu.memory_space<smem>>
      %410 = vector.broadcast %409 : f32 to vector<1x1x256xf32>
      %411 = arith.mulf %410, %392 : vector<1x1x256xf32>
      %412 = arith.addf %379, %411 : vector<1x1x256xf32>
      %c47 = arith.constant 47 : index
      %413 = memref.load %arg2[%c47] : memref<98xf32, #tpu.memory_space<smem>>
      %414 = vector.broadcast %413 : f32 to vector<1x1x256xf32>
      %415 = arith.mulf %414, %392 : vector<1x1x256xf32>
      %416 = arith.addf %383, %415 : vector<1x1x256xf32>
      %c48 = arith.constant 48 : index
      %417 = memref.load %arg2[%c48] : memref<98xf32, #tpu.memory_space<smem>>
      %418 = vector.broadcast %417 : f32 to vector<1x1x256xf32>
      %419 = arith.mulf %418, %392 : vector<1x1x256xf32>
      %420 = arith.addf %387, %419 : vector<1x1x256xf32>
      %c208_i32_48 = arith.constant 208 : i32
      %421 = tpu.dynamic_rotate %18 by %c208_i32_48 dim 2 : vector<1x1x256xf32>, i32 -> vector<1x1x256xf32>
      %422 = vector.shape_cast %389 : vector<1x256xf32> to vector<1x1x256xf32>
      %423 = arith.mulf %421, %422 : vector<1x1x256xf32>
      %c91 = arith.constant 91 : index
      %424 = memref.load %arg2[%c91] : memref<98xf32, #tpu.memory_space<smem>>
      %425 = vector.broadcast %424 : f32 to vector<1x1x256xf32>
      %426 = arith.mulf %425, %423 : vector<1x1x256xf32>
      %427 = arith.addf %396, %426 : vector<1x1x256xf32>
      %c92 = arith.constant 92 : index
      %428 = memref.load %arg2[%c92] : memref<98xf32, #tpu.memory_space<smem>>
      %429 = vector.broadcast %428 : f32 to vector<1x1x256xf32>
      %430 = arith.mulf %429, %423 : vector<1x1x256xf32>
      %431 = arith.addf %400, %430 : vector<1x1x256xf32>
      %c93 = arith.constant 93 : index
      %432 = memref.load %arg2[%c93] : memref<98xf32, #tpu.memory_space<smem>>
      %433 = vector.broadcast %432 : f32 to vector<1x1x256xf32>
      %434 = arith.mulf %433, %423 : vector<1x1x256xf32>
      %435 = arith.addf %404, %434 : vector<1x1x256xf32>
      %c94 = arith.constant 94 : index
      %436 = memref.load %arg2[%c94] : memref<98xf32, #tpu.memory_space<smem>>
      %437 = vector.broadcast %436 : f32 to vector<1x1x256xf32>
      %438 = arith.mulf %437, %423 : vector<1x1x256xf32>
      %439 = arith.addf %408, %438 : vector<1x1x256xf32>
      %c95 = arith.constant 95 : index
      %440 = memref.load %arg2[%c95] : memref<98xf32, #tpu.memory_space<smem>>
      %441 = vector.broadcast %440 : f32 to vector<1x1x256xf32>
      %442 = arith.mulf %441, %423 : vector<1x1x256xf32>
      %443 = arith.addf %412, %442 : vector<1x1x256xf32>
      %c96 = arith.constant 96 : index
      %444 = memref.load %arg2[%c96] : memref<98xf32, #tpu.memory_space<smem>>
      %445 = vector.broadcast %444 : f32 to vector<1x1x256xf32>
      %446 = arith.mulf %445, %423 : vector<1x1x256xf32>
      %447 = arith.addf %416, %446 : vector<1x1x256xf32>
      %c97 = arith.constant 97 : index
      %448 = memref.load %arg2[%c97] : memref<98xf32, #tpu.memory_space<smem>>
      %449 = vector.broadcast %448 : f32 to vector<1x1x256xf32>
      %450 = arith.mulf %449, %423 : vector<1x1x256xf32>
      %451 = arith.addf %420, %450 : vector<1x1x256xf32>
      %c3_i32 = arith.constant 3 : i32
      %452 = tpu.dynamic_rotate %427 by %c3_i32 dim 2 : vector<1x1x256xf32>, i32 -> vector<1x1x256xf32>
      %c0_49 = arith.constant 0 : index
      %c0_50 = arith.constant 0 : index
      %c0_51 = arith.constant 0 : index
      %453 = vector.load %arg4[%c0_49, %c0_50, %c0_51] : memref<7x1x256xf32, #tpu.memory_space<vmem>>, vector<1x1x256xf32>
      %454 = vector.shape_cast %453 : vector<1x1x256xf32> to vector<1x256xf32>
      %455 = vector.shape_cast %454 : vector<1x256xf32> to vector<1x1x256xf32>
      %456 = arith.mulf %455, %452 : vector<1x1x256xf32>
      %457 = arith.addf %439, %456 : vector<1x1x256xf32>
      %c2_i32 = arith.constant 2 : i32
      %458 = tpu.dynamic_rotate %431 by %c2_i32 dim 2 : vector<1x1x256xf32>, i32 -> vector<1x1x256xf32>
      %c1_52 = arith.constant 1 : index
      %c0_53 = arith.constant 0 : index
      %c0_54 = arith.constant 0 : index
      %459 = vector.load %arg4[%c1_52, %c0_53, %c0_54] : memref<7x1x256xf32, #tpu.memory_space<vmem>>, vector<1x1x256xf32>
      %460 = vector.shape_cast %459 : vector<1x1x256xf32> to vector<1x256xf32>
      %461 = vector.shape_cast %460 : vector<1x256xf32> to vector<1x1x256xf32>
      %462 = arith.mulf %461, %458 : vector<1x1x256xf32>
      %463 = arith.addf %457, %462 : vector<1x1x256xf32>
      %c1_i32 = arith.constant 1 : i32
      %464 = tpu.dynamic_rotate %435 by %c1_i32 dim 2 : vector<1x1x256xf32>, i32 -> vector<1x1x256xf32>
      %c2_55 = arith.constant 2 : index
      %c0_56 = arith.constant 0 : index
      %c0_57 = arith.constant 0 : index
      %465 = vector.load %arg4[%c2_55, %c0_56, %c0_57] : memref<7x1x256xf32, #tpu.memory_space<vmem>>, vector<1x1x256xf32>
      %466 = vector.shape_cast %465 : vector<1x1x256xf32> to vector<1x256xf32>
      %467 = vector.shape_cast %466 : vector<1x256xf32> to vector<1x1x256xf32>
      %468 = arith.mulf %467, %464 : vector<1x1x256xf32>
      %469 = arith.addf %463, %468 : vector<1x1x256xf32>
      %c255_i32 = arith.constant 255 : i32
      %470 = tpu.dynamic_rotate %443 by %c255_i32 dim 2 : vector<1x1x256xf32>, i32 -> vector<1x1x256xf32>
      %c4_58 = arith.constant 4 : index
      %c0_59 = arith.constant 0 : index
      %c0_60 = arith.constant 0 : index
      %471 = vector.load %arg4[%c4_58, %c0_59, %c0_60] : memref<7x1x256xf32, #tpu.memory_space<vmem>>, vector<1x1x256xf32>
      %472 = vector.shape_cast %471 : vector<1x1x256xf32> to vector<1x256xf32>
      %473 = vector.shape_cast %472 : vector<1x256xf32> to vector<1x1x256xf32>
      %474 = arith.mulf %473, %470 : vector<1x1x256xf32>
      %475 = arith.addf %469, %474 : vector<1x1x256xf32>
      %c254_i32 = arith.constant 254 : i32
      %476 = tpu.dynamic_rotate %447 by %c254_i32 dim 2 : vector<1x1x256xf32>, i32 -> vector<1x1x256xf32>
      %c5_61 = arith.constant 5 : index
      %c0_62 = arith.constant 0 : index
      %c0_63 = arith.constant 0 : index
      %477 = vector.load %arg4[%c5_61, %c0_62, %c0_63] : memref<7x1x256xf32, #tpu.memory_space<vmem>>, vector<1x1x256xf32>
      %478 = vector.shape_cast %477 : vector<1x1x256xf32> to vector<1x256xf32>
      %479 = vector.shape_cast %478 : vector<1x256xf32> to vector<1x1x256xf32>
      %480 = arith.mulf %479, %476 : vector<1x1x256xf32>
      %481 = arith.addf %475, %480 : vector<1x1x256xf32>
      %c253_i32 = arith.constant 253 : i32
      %482 = tpu.dynamic_rotate %451 by %c253_i32 dim 2 : vector<1x1x256xf32>, i32 -> vector<1x1x256xf32>
      %c6_64 = arith.constant 6 : index
      %c0_65 = arith.constant 0 : index
      %c0_66 = arith.constant 0 : index
      %483 = vector.load %arg4[%c6_64, %c0_65, %c0_66] : memref<7x1x256xf32, #tpu.memory_space<vmem>>, vector<1x1x256xf32>
      %484 = vector.shape_cast %483 : vector<1x1x256xf32> to vector<1x256xf32>
      %485 = vector.shape_cast %484 : vector<1x256xf32> to vector<1x1x256xf32>
      %486 = arith.mulf %485, %482 : vector<1x1x256xf32>
      %487 = arith.addf %481, %486 : vector<1x1x256xf32>
      %488 = arith.negf %487 : vector<1x1x256xf32>
      %489 = math.exp %488 : vector<1x1x256xf32>
      %cst_67 = arith.constant 1.000000e+00 : f32
      %490 = vector.broadcast %cst_67 : f32 to vector<1x1x256xf32>
      %491 = arith.addf %490, %489 : vector<1x1x256xf32>
      %492 = arith.divf %490, %491 : vector<1x1x256xf32>
      %c0_68 = arith.constant 0 : index
      %c0_69 = arith.constant 0 : index
      %c0_70 = arith.constant 0 : index
      %493 = vector.load %arg6[%c0_68, %c0_69, %c0_70] : memref<1x1x256xf32, #tpu.memory_space<vmem>>, vector<1x1x256xf32>
      tpu.vector_store %arg6[%c0_68, %c0_69, %c0_70], %492 {strides = array<i32>} : memref<1x1x256xf32, #tpu.memory_space<vmem>>, vector<1x1x256xf32>,
    } else {
    }
    return
  }
  func.func @transform_0(%arg0: i32, %arg1: i32) -> i32 {
    %c0_i32 = arith.constant 0 : i32
    %c0_i32_0 = arith.constant 0 : i32
    return %c0_i32 : i32
  }
  func.func @transform_1(%arg0: i32, %arg1: i32) -> (i32, i32, i32) {
    %c0_i32 = arith.constant 0 : i32
    %c0_i32_0 = arith.constant 0 : i32
    %c0_i32_1 = arith.constant 0 : i32
    %c0_i32_2 = arith.constant 0 : i32
    return %c0_i32, %c0_i32_0, %c0_i32_1 : i32, i32, i32
  }
  func.func @transform_2(%arg0: i32, %arg1: i32) -> (i32, i32, i32) {
    %c0_i32 = arith.constant 0 : i32
    %c0_i32_0 = arith.constant 0 : i32
    %c0_i32_1 = arith.constant 0 : i32
    %c0_i32_2 = arith.constant 0 : i32
    return %c0_i32, %c0_i32_0, %c0_i32_1 : i32, i32, i32
  }
  func.func @transform_3(%arg0: i32, %arg1: i32) -> (i32, i32, i32) {
    %c0_i32 = arith.constant 0 : i32
    %c0_i32_0 = arith.constant 0 : i32
    return %arg0, %arg1, %c0_i32 : i32, i32, i32
  }
  func.func @transform_4(%arg0: i32, %arg1: i32) -> (i32, i32, i32) {
    %c0_i32 = arith.constant 0 : i32
    %c0_i32_0 = arith.constant 0 : i32
    %c0_i32_1 = arith.constant 0 : i32
    return %arg0, %c0_i32, %c0_i32_0 : i32, i32, i32
  }
}

</mosaic_0001>

<bundles_post_ra>
// kernel: tpu_custom_call.1
= control target key start
LH: loop header
LB: loop body
LE: loop exit
PB: predicated region body
PF: predicated region fallthrough
CT: control target
= control target key end

     0   :  { %s3633_s0 = inlined_call_operand.hbm [shape: f32[98], index: 0, kind: input, shape index: {}]   ;;  %s3634_s1 = inlined_call_operand.hbm [shape: f32[7,1,256], index: 1, kind: input, shape index: {}]   ;;  %s3635_s2 = inlined_call_operand.hbm [shape: f32[7,1,256], index: 2, kind: input, shape index: {}]   ;;  %s3636_s3 = inlined_call_operand.hbm [shape: f32[2,4,256], index: 3, kind: input, shape index: {}]   ;;  %s3637_s4 = inlined_call_operand.hbm [shape: f32[2,1,256], index: 4, kind: output, shape index: {}]  }
   0x1   :  { %3773 = sst [smem:[#allocation117_spill]] %s3633_s0 }
   0x2   :  { %3774 = sst [smem:[#allocation118_spill]] %s3634_s1 }
   0x3   :  { %3775 = sst [smem:[#allocation119_spill]] %s3635_s2 }
   0x4   :  { %3776 = sst [smem:[#allocation120_spill]] %s3636_s3 }
   0x5   :  { %3777 = sst [smem:[#allocation121_spill]] %s3637_s4 }
   0x6   :  { %9 = vsyncpa [#allocation7], 0 }
   0x7   :  { %10 = vsyncpa [#allocation5], 0 }
   0x8   :  { %11 = vsyncpa [#allocation10], 0 }
   0x9   :  { %12 = vsyncpa [#allocation6], 0 }
   0xa   :  { %14 = vsyncpa [#allocation6 + $0x1], 0  ;;  %s2156_s15 = smov 0   ;;  %s2158_s16 = smov 0  }
   0xb   :  { %s2160_s17 = smov 0   ;;  %s2162_s18 = smov 0  }
   0xc   :  { %s2164_s19 = smov 0   ;;  %s2166_s20 = smov 0  }
   0xd LB: > { %3778 = sst [smem:[#allocation18_spill]] %s2087_s15  ;;  %s2187_s21 = sadd.s32 4294967295, %s2107_s20   ;;  %s2107_s20 = sphi %s2166_s20, %s20_s20   ;;  %s2103_s19 = sphi %s2164_s19, %s4213_s19   ;;  %s2099_s18 = sphi %s2162_s18, %s4212_s18   ;;  %s2095_s17 = sphi %s2160_s17, %s4211_s17   ;;  %s2091_s16 = sphi %s2158_s16, %s4210_s16   ;;  %s2087_s15 = sphi %s2156_s15, %s4209_s15  }
   0xe   : > { %3779 = sst [smem:[#allocation19_spill]] %s2091_s16  ;;  %s1684_s22 = sadd.s32 4294967294, %s2107_s20  }
   0xf   : > { %3780 = sst [smem:[#allocation20_spill]] %s2095_s17  ;;  %p117_p0 = scmp.ne.s32.totalorder %s2091_s16, %s2087_s15 }
  0x10   : > { %3781 = sst [smem:[#allocation21_spill]] %s2099_s18  ;;  %p3638_p1 = scmp.eq.s32.totalorder %s2187_s21, 0 }
  0x11   : > { %3782 = sst [smem:[#allocation22_spill]] %s2103_s19  ;;  %p147_p3 = scmp.eq.s32.totalorder %s1684_s22, 1 }
  0x12   : > { %3783 = sst [smem:[#allocation23_spill]] %s2107_s20  ;;  %p2196_p4 = por %p3638_p1, %p117_p0 }
  0x13   : > { %p1685_p5 = scmp.ge.s32.totalorder %s2107_s20, 1  ;;  %p2201_p6 = por %p147_p3, %p117_p0 }
  0x14   : > { %p154_p7 = scmp.lt.s32.totalorder %s2107_s20, 3  ;;  %s2109_s26 = smov [#allocation8]  }
  0x15   : > { %s3785_s24 = scalar_select %p2201_p6, 1, 0 }
  0x16   : > { %p2206_p8 = pnand %p1685_p5, %p154_p7  ;;  %s175_s27 = sshll.u32 %s2109_s26, 4  ;;  %s176_s27 = int_to_ptr.vmem [resolvable:$true] %s175_s27 }
  0x17   : > { %3786 = sst [smem:[#allocation24_spill]] %s3785_s24  ;;  %s2110_s29 = smov [#allocation9]  }
  0x18   : > { %p1821_p9 = pneg %p2206_p8  ;;  %s188_s30 = sshll.u32 %s2110_s29, 4  ;;  %s189_s30 = int_to_ptr.vmem [resolvable:$true] %s188_s30 }
  0x19   : > { %s1935_s5 = scalar_lea.vmem %s176_s27, 224  ;;  %p1943_p5 = scmp.lt.s32.totalorder %s176_s27, %s176_s27 }
  0x1a   : > { %p2215_p11 = pnand %p1821_p9, %p3638_p1  ;;  %p1936_p13 = scmp.ne.s32.totalorder %s176_s27, %s1935_s5 }
  0x1b   : > { %p1944_p7 = scmp.lt.s32.totalorder %s1935_s5, %s1935_s5 }
  0x1c   : > { %p1926_p12 = pneg %p2215_p11 }
  0x1d   : > { %p1945_p10 = por %p1944_p7, %p1943_p5 }
  0x1e   : > { %p1938_p0 = pnand %p1936_p13, %p1926_p12 }
  0x20   : > { %p1939_p3 = pneg %p1938_p0 }
  0x22   : > { %p1946_p2 = pnand %p1945_p10, %p1939_p3 }
  0x24   : > { %1949 = shalt.err (!%p1946_p2)
}
  0x25   : > { %s2111_s6 = smov 32   ;;  %s2112_s7 = smov 2  }
  0x26   : > { %s3789_s1 = sld [smem:[#allocation118_spill]]  ;;  %s2113_s10 = smov [#allocation4]  }
  0x27   : > { %s3790_s0 = sld [smem:[#allocation117_spill]]  ;;  %s1972_s13 = scalar_lea.vmem %s189_s30, 224 }
  0x28   : > { %p1973_p9 = scmp.ne.s32.totalorder %s189_s30, %s1972_s13  ;;  %p1980_p13 = scmp.lt.s32.totalorder %s189_s30, %s189_s30 }
  0x29   : > { %p1981_p0 = scmp.lt.s32.totalorder %s1972_s13, %s1972_s13 }
  0x2a   : > { %p1975_p2 = pnand %p1973_p9, %p1926_p12 }
  0x2b   : > { %p1982_p3 = por %p1981_p0, %p1980_p13 }
  0x2c   : > { %1827 = dma.hbm_to_vmem [thread:$0]  (!%p2215_p11), %s3789_s1, 224, %s176_s27, [#allocation5], %s2111_s6, %s2111_s6, %s2112_s7  }
  0x2d   : > { %1824 = dma.hbm_to_smem (!%p2215_p11), %s3790_s0, 16, %s2113_s10, [#allocation7]  }
  0x2e   : > { %p1976_p10 = pneg %p1975_p2 }
  0x30   : > { %p1983_p5 = pnand %p1982_p3, %p1976_p10 }
  0x32   : > { %1986 = shalt.err (!%p1983_p5)
}
  0x33   : > { %s3791_s2 = sld [smem:[#allocation119_spill]]  ;;  %s104_s26 = sadd.s32 1, %s2095_s17 }
  0x34   : > { %s32_s27 = sadd.s32 1, %s2103_s19  ;;  %p111_p12 = scmp.ne.s32.totalorder %s2095_s17, %s2091_s16 }
  0x35   : > { %p34_p7 = scmp.ge.s32.totalorder %s32_s27, 2  ;;  %p112_p9 = scmp.eq.s32.totalorder %s2107_s20, 0 }
  0x36   : > { %p3792_p2 = scmp.eq.s32.totalorder %s2187_s21, 1  ;;  %p1842_p13 = scmp.lt.s32.totalorder %s2107_s20, 2 }
  0x37   : > { %s4215_s27 = smov (%p34_p7, %s32_s27), 0  ;;  %p113_p0 = por %p112_p9, %p111_p12 }
  0x38   : > { %p2249_p10 = por %p3792_p2, %p111_p12  ;;  %3795 = sst [smem:[#allocation26_spill]] %s4215_s27 }
  0x39   : > { %1830 = dma.hbm_to_vmem [thread:$0]  (!%p2215_p11), %s3791_s2, 224, %s189_s30, [#allocation10], %s2111_s6, %s2111_s6, %s2112_s7  }
  0x3a   : > { %s3793_s28 = scalar_select %p2249_p10, 1, 0 }
  0x3b   : > { %s202_s29 = sand.u32 1, %s2107_s20   ;;  %s99_s5 = ssub.s32 %s2103_s19, %s4215_s27 }
  0x3c   : > { %3794 = sst [smem:[#allocation25_spill]] %s3793_s28  ;;  %p102_p11 = scmp.eq.s32.totalorder %s99_s5, 0 }
  0x3d   : > { %s204_s30 = sand.u32 1, %s2095_s17   ;;  %s1803_s7 = sshll.u32 %s2103_s19, 7 }
  0x3e   : > { %s1690_s6 = sshll.u32 %s204_s30, 3  ;;  %s3797_s3 = sld [smem:[#allocation120_spill]] }
  0x3f   : > { %s2262_s8 = scalar_select %p102_p11, %s2095_s17, %s104_s26  }
  0x40   : > { %s206_s12 = scalar_lea.vmem [#allocation11], %s1690_s6  ;;  %p2269_p3 = pnand %p1842_p13, %p113_p0 }
  0x41   : > { %3796 = sst [smem:[#allocation27_spill]] %s2262_s8  ;;  %s216_s13 = sshll.u32 %s206_s12, 4  ;;  %s217_s13 = int_to_ptr.vmem [resolvable:$true] %s216_s13 }
  0x42   : > { %s203_s22 = scalar_lea.sflag [#allocation5], %s202_s29  ;;  %p1989_p5 = pneg %p2269_p3 }
  0x43   : > { %s2000_s5 = scalar_lea.vmem %s217_s13, 128  ;;  %s2114_s26 = smov [#allocation11]  }
  0x44   : > { %s214_s11 = scalar_lea.hbm %s3797_s3, %s1803_s7  ;;  %p2001_p12 = scmp.ne.s32.totalorder %s217_s13, %s2000_s5 }
  0x45   : > { %s2005_s30 = sshll.u32 %s2114_s26, 4  ;;  %s2006_s30 = int_to_ptr.vmem [resolvable:$false] %s2005_s30 }
  0x46   : > { %p2003_p7 = pnand %p2001_p12, %p1989_p5  ;;  %s2007_s7 = scalar_lea.vmem %s2006_s30, 256 }
  0x47   : > { %p2008_p2 = scmp.lt.s32.totalorder %s217_s13, %s2006_s30  ;;  %p2009_p11 = scmp.lt.s32.totalorder %s2007_s7, %s2000_s5 }
  0x48   : > { %p2004_p9 = pneg %p2003_p7 }
  0x49   : > { %p2010_p1 = por %p2009_p11, %p2008_p2 }
  0x4b   : > { %p2011_p13 = pnand %p2010_p1, %p2004_p9 }
  0x4d   : > { %2014 = shalt.err (!%p2011_p13)
}
  0x4e   : > { %1834 = dma.hbm_to_vmem [thread:$0]  (!%p2269_p3), %s214_s11, 128, %s217_s13, %s203_s22  }
  0x4f   : > { %225 = sbr.rel (%p2206_p8) target bundleno = 605 (0x25d), region = 36 }
  0x54   : > { %p3799_p0 = scmp.eq.s32.totalorder %s2187_s21, 0 }
  0x56   : > { %2066 = dma.done.wait (%p3799_p0), [#allocation7], 16   ;;  %p3800_p5 = pmov %p3799_p0 }
  0x57   : > { %p3801_p12 = pmov %p3799_p0 }
  0x58   : > { %2068 = vsyncadd (%p3800_p5), [#allocation7], 4294967280 }
  0x59   : > { %2070 = dma.done.wait (%p3801_p12), [#allocation5], 224   ;;  %p3802_p7 = pmov %p3799_p0 }
  0x5a   : > { %p3803_p1 = pmov %p3799_p0 }
  0x5b   : > { %2072 = vsyncadd (%p3802_p7), [#allocation5], 4294967072 }
  0x5c   : > { %2074 = dma.done.wait (%p3803_p1), [#allocation10], 224   ;;  %p3804_p3 = pmov %p3799_p0 }
  0x5d   : > { %s239_s25 = sand.u32 1, %s2187_s21   ;;  %s2293_s29 = sand.u32 1, %s2091_s16  }
  0x5e   : > { %2076 = vsyncadd (%p3804_p3), [#allocation10], 4294967072  ;;  %3805 = sst [smem:[#allocation28_spill]] %s2293_s29  ;;  %s1697_s6 = sshll.u32 %s2293_s29, 3 }
  0x5f   : > { %s240_s9 = scalar_lea.sflag [#allocation5], %s239_s25  ;;  %s243_s10 = scalar_lea.vmem [#allocation11], %s1697_s6 }
  0x60   : > { %2078 = dma.done.wait (%p2196_p4), %s240_s9, 128  }
  0x61   : > { %2080 = vsyncadd (%p2196_p4), %s240_s9, 4294967168 }
  0x62   : > { %248 = sfence }
  0x63   : > { %v273_v0 = vlaneseq  ;;  %v279_v1 = vld [vmem:[%s243_s10] sm:$0xff]  ;;  %vm284_vm0 = vcmask 1043456   ;;  %v3806_v4 = vmov 0  ;;  %v2115_v7 = vmov -inf   ;;  %s2118_s21 = smov 48   ;;  %s2119_s23 = smov 32  }
  0x64   : > { %v282_v2 = vcombine.high %v279_v1, %v279_v1  ;;  %v324_v3 = vsel %vm284_vm0, %v279_v1, -inf  ;;  %v285_v6 = vsel %vm284_vm0, %v279_v1, 0.0  ;;  %v2116_v9 = vmov 0.0   ;;  %s2120_s11 = smov 16   ;;  %s2336_s12 = sld [smem:[#allocation4 + $0x31]] }
  0x65   : > { %vm2301_vm1 = vcmp.lt.s32.totalorder %v273_v0, 256  ;;  %v325_v5 = vrot.slane %v324_v3, 4  ;;  %v286_v10 = vrot.slane %v285_v6, 4  ;;  %v2117_v16 = vmov 1966171168   ;;  %s2338_s13 = sld [smem:[#allocation4 + $0x32]] }
  0x66   : > { %v3807_v4 = vsel %vm2301_vm1, 4294967295, %v3806_v4  ;;  %278 = vst.msk [vmem:[#allocation3] sm:$0x3] %vm2301_vm1, %v2115_v7  ;;  %v331_v8 = vsel %vm284_vm0, %v282_v2, -inf  ;;  %277 = vst.msk [vmem:[#allocation2] sm:$0x3] %vm2301_vm1, %v2116_v9  ;;  %v303_v17 = vunpack.c.l.s4 %v2117_v16 }
  0x67   : > { %3808 = vst [vmem:[#allocation29_spill] sm:$0xff] %v3807_v4  ;;  %v292_v11 = vsel %vm284_vm0, %v282_v2, 0.0  ;;  %v326_v12 = vmax.f32 %v324_v3, %v325_v5  ;;  %v332_v13 = vrot.slane %v331_v8, 4  ;;  %v287_v14 = vadd.f32 %v286_v10, %v285_v6  ;;  %s2340_s14 = sld [smem:[#allocation4 + $0x33]]  ;;  %s2121_s30 = smov 112  }
  0x68   : > { %v293_v15 = vrot.slane %v292_v11, 4  ;;  %v304_v26 = vunpack.c.0.s8 %v303_v17  ;;  %v306_v27 = vshrl.u32 %v273_v0, 7  ;;  %s2342_s22 = sld [smem:[#allocation4 + $0x34]]  ;;  %s2122_s0 = smov 96   ;;  %v363_v57 = vld [vmem:[#allocation8] sm:$0x3] }
  0x69   : > { %v327_v18 = vrot.slane %v326_v12, 2  ;;  %v333_v19 = vmax.f32 %v331_v8, %v332_v13  ;;  %v288_v20 = vrot.slane %v287_v14, 2  ;;  %s2344_s5 = sld [smem:[#allocation4 + $0x35]]  ;;  %s2123_s16 = smov 80   ;;  %v2467_v58 = vand.u32 127, %v273_v0 }
  0x6a   : > { %v294_v21 = vadd.f32 %v293_v15, %v292_v11  ;;  %v2310_v36 = vsub.s32 %v304_v26, %v306_v27  ;;  %v2320_v49 = vsub.s32 0, %v306_v27  ;;  %v2322_v50 = vsub.s32 1, %v306_v27  ;;  %3810 = sst [smem:[#allocation31_spill]] %s2336_s12  ;;  %v487_v61 = vld [vmem:[#allocation8 + $0x2] sm:$0x3] }
  0x6b   : > { %v328_v22 = vmax.f32 %v326_v12, %v327_v18  ;;  %v334_v23 = vrot.slane %v333_v19, 2  ;;  %v289_v24 = vadd.f32 %v288_v20, %v287_v14  ;;  %3811 = sst [smem:[#allocation32_spill]] %s2338_s13  ;;  %v445_v62 = vstv %s2336_s12  ;;  %v601_v11 = vld [vmem:[#allocation8 + $0x4] sm:$0x3] }
  0x6c   : > { %v295_v25 = vrot.slane %v294_v21, 2  ;;  %3809 = vst [vmem:[#allocation30_spill] sm:$0xff] %v2310_v36  ;;  %s2346_s26 = sld [smem:[#allocation4 + $0x36]]  ;;  %v2470_v59 = vrot.slane %v363_v57, %v2320_v49  ;;  %v2473_v60 = vrot.slane %v363_v57, %v2322_v50  ;;  %v451_v63 = vstv %s2338_s13 }
  0x6d   : > { %v329_v28 = vrot.slane %v328_v22, 1  ;;  %v335_v29 = vmax.f32 %v333_v19, %v334_v23  ;;  %v290_v30 = vrot.slane %v289_v24, 1  ;;  %v323_v42 = vld [vmem:[#allocation3] sm:$0x3]  ;;  %v280_v45 = vld [vmem:[#allocation2] sm:$0x3]  ;;  %v457_v1 = vstv %s2340_s14 }
  0x6e   : > { %v296_v31 = vadd.f32 %v295_v25, %v294_v21  ;;  %3812 = sst [smem:[#allocation33_spill]] %s2340_s14  ;;  %v463_v2 = vstv %s2342_s22  ;;  %v2492_v9 = vrot.slane %v487_v61, %v2320_v49  ;;  %v2495_v10 = vrot.slane %v487_v61, %v2322_v50 }
  0x6f   : > { %v330_v32 = vmax.f32 %v328_v22, %v329_v28  ;;  %v336_v33 = vrot.slane %v335_v29, 1  ;;  %v291_v34 = vadd.f32 %v290_v30, %v289_v24  ;;  %3813 = sst [smem:[#allocation34_spill]] %s2342_s22  ;;  %v469_v0 = vstv %s2344_s5  ;;  %v939_v24 = vld [vmem:[#allocation8 + $0x8] sm:$0x3]  ;;  %v1053_v28 = vld [vmem:[#allocation8 + $0xa] sm:$0x3] }
  0x70   : > { %v297_v35 = vrot.slane %v296_v31, 1  ;;  %3814 = sst [smem:[#allocation35_spill]] %s2344_s5  ;;  %v2515_v23 = vrot.slane %v601_v11, %v2320_v49  ;;  %v2522_v27 = vrot.slane %v601_v11, %v2322_v50  ;;  %vm381_vm2 = vcmp.lt.s32.totalorder %v2467_v58, 48 }
  0x71   : > { %v337_v37 = vmax.f32 %v335_v29, %v336_v33  ;;  %s2348_s7 = sld [smem:[#allocation4 + $0x37]]  ;;  %vm492_vm3 = vcmp.lt.s32.totalorder %v2467_v58, 32  ;;  %vm606_vm4 = vcmp.lt.s32.totalorder %v2467_v58, 16  ;;  %vm944_vm5 = vcmp.lt.s32.totalorder %v2467_v58, 112 }
  0x72   : > { %v298_v38 = vadd.f32 %v297_v35, %v296_v31  ;;  %3815 = sst [smem:[#allocation36_spill]] %s2346_s26  ;;  %v475_v3 = vstv %s2346_s26  ;;  %v2541_v35 = vrot.slane %v939_v24, %v2322_v50  ;;  %vm1058_vm6 = vcmp.lt.s32.totalorder %v2467_v58, 96 }
  0x73   : > { %v340_v39 = vcombine.low %v330_v32, %v337_v37  ;;  %s2350_s25 = sld [smem:[#allocation4]]  ;;  %vm1172_vm7 = vcmp.lt.s32.totalorder %v2467_v58, 80  ;;  %vm1284_vm8 = vcmp.lt.s32.totalorder %v2467_v58, 3  ;;  %vm1324_vm9 = vcmp.lt.s32.totalorder %v2467_v58, 2 }
  0x74   : > { %v301_v40 = vcombine.low %v291_v34, %v298_v38  ;;  %s2352_s6 = sld [smem:[#allocation4 + $0x1]]  ;;  %v2538_v34 = vrot.slane %v939_v24, %v2320_v49  ;;  %vm1365_vm10 = vcmp.lt.s32.totalorder %v2467_v58, 1  ;;  %vm1406_vm11 = vcmp.lt.s32.totalorder %v2467_v58, 127 }
  0x75   : > { %v347_v41 = vrot.slane %v340_v39, %v2310_v36  ;;  %s2354_s9 = sld [smem:[#allocation4 + $0x2]]  ;;  %vm1447_vm12 = vcmp.lt.s32.totalorder %v2467_v58, 126  ;;  %vm1488_vm13 = vcmp.lt.s32.totalorder %v2467_v58, 125 }
  0x76   : > { %v308_v43 = vrot.slane %v301_v40, %v2310_v36  ;;  %s2356_s10 = sld [smem:[#allocation4 + $0x3]]  ;;  %v2549_v40 = vrot.slane %v1053_v28, %v2320_v49 }
  0x77   : > { %v354_v44 = vrot.slane %v347_v41, %v2310_v36  ;;  %3816 = sst [smem:[#allocation37_spill]] %s2348_s7  ;;  %v481_v5 = vstv %s2348_s7  ;;  %v2552_v41 = vrot.slane %v1053_v28, %v2322_v50 }
  0x78   : > { %v315_v46 = vrot.slane %v308_v43, %v2310_v36  ;;  %s2364_s1 = sld [smem:[#allocation4 + $0x7]] }
  0x79   : > { %v356_v47 = vmax.f32 %v323_v42, %v354_v44  ;;  %3817 = sst [smem:[#allocation38_spill]] %s2350_s25  ;;  %v398_v6 = vstv %s2350_s25  ;;  %v1167_v42 = vld [vmem:[#allocation8 + $0xc] sm:$0x3] }
  0x7a   : > { %v317_v48 = vadd.f32 %v315_v46, %v280_v45  ;;  %3818 = sst [smem:[#allocation39_spill]] %s2352_s6  ;;  %v402_v7 = vstv %s2352_s6  ;;  %v2580_v57 = vrot.slane %v1167_v42, %v2322_v50 }
  0x7b   : > { %357 = vst.msk [vmem:[#allocation3] sm:$0x3] %vm2301_vm1, %v356_v47  ;;  %3819 = sst [smem:[#allocation40_spill]] %s2354_s9  ;;  %v406_v8 = vstv %s2354_s9 }
  0x7c   : > { %322 = vst.msk [vmem:[#allocation2] sm:$0x3] %vm2301_vm1, %v317_v48  ;;  %3820 = sst [smem:[#allocation41_spill]] %s2356_s10  ;;  %v410_v12 = vstv %s2356_s10 }
  0x7d   : > { %s2366_s2 = sld [smem:[#allocation4 + $0x8]] }
  0x7e   : > { %3824 = sst [smem:[#allocation45_spill]] %s2364_s1 }
  0x7f   : > { %s2368_s3 = sld [smem:[#allocation4 + $0x9]] }
  0x80   : > { %s2370_s27 = sld [smem:[#allocation4 + $0xa]] }
  0x81   : > { %s2372_s19 = sld [smem:[#allocation4 + $0xb]] }
  0x82   : > { %v2324_v51 = vld [vmem:[#allocation3] sm:$0x3]  ;;  %s2376_s8 = sld [smem:[#allocation4 + $0xd]] }
  0x83   : > { %v429_v52 = vrot.slane %v2324_v51, %v2320_v49  ;;  %v2328_v53 = vld [vmem:[#allocation2] sm:$0x3]  ;;  %v433_v55 = vrot.slane %v2324_v51, %v2322_v50  ;;  %3825 = sst [smem:[#allocation46_spill]] %s2366_s2 }
  0x84   : > { %v368_v54 = vrot.slane %v2328_v53, %v2320_v49  ;;  %v372_v56 = vrot.slane %v2328_v53, %v2322_v50  ;;  %s2378_s17 = sld [smem:[#allocation4 + $0x3b]] }
  0x85   : > { %436 = vrot.lane.b32.xlu1 %v429_v52, %s2118_s21  ;;  %3826 = sst [smem:[#allocation47_spill]] %s2368_s3 }
  0x86   : > { %375 = vrot.lane.b32.xlu0 %v368_v54, %s2118_s21  ;;  %3827 = sst [smem:[#allocation48_spill]] %s2370_s27 }
  0x87   : > { %3828 = sst [smem:[#allocation49_spill]] %s2372_s19 }
  0x88   : > { %3830 = sst [smem:[#allocation51_spill]] %s2376_s8 }
  0x89   : > { %438 = vrot.lane.b32.xlu1 %v433_v55, %s2118_s21  ;;  %s2380_s20 = sld [smem:[#allocation4 + $0x11]] }
  0x8a   : > { %377 = vrot.lane.b32.xlu0 %v372_v56, %s2118_s21  ;;  %s2358_s21 = sld [smem:[#allocation4 + $0x4]] }
  0x8b   : > { %3831 = sst [smem:[#allocation52_spill]] %s2378_s17 }
  0x8c   : > { %s2382_s24 = sld [smem:[#allocation4 + $0x38]] }
  0x8d   : > { %490 = vrot.lane.b32.xlu1 %v372_v56, %s2119_s23  ;;  %s2384_s15 = sld [smem:[#allocation4 + $0xe]] }
  0x8e   : > { %488 = vrot.lane.b32.xlu0 %v368_v54, %s2119_s23  ;;  %s2386_s4 = sld [smem:[#allocation4 + $0x42]] }
  0x8f   : > { %3832 = sst [smem:[#allocation53_spill]] %s2380_s20 }
  0x90   : > { %3821 = sst [smem:[#allocation42_spill]] %s2358_s21  ;;  %v3754_v13 = vstv %s2358_s21 }
  0x91   : > { %552 = vrot.lane.b32.xlu1 %v433_v55, %s2119_s23  ;;  %s2388_s28 = sld [smem:[#allocation4 + $0x3f]] }
  0x92   : > { %550 = vrot.lane.b32.xlu0 %v429_v52, %s2119_s23  ;;  %s2360_s23 = sld [smem:[#allocation4 + $0x5]] }
  0x93   : > { %3833 = sst [smem:[#allocation54_spill]] %s2382_s24 }
  0x94   : > { %3834 = sst [smem:[#allocation55_spill]] %s2384_s15 }
  0x95   : > { %604 = vrot.lane.b32.xlu1 %v372_v56, %s2120_s11  ;;  %3835 = sst [smem:[#allocation56_spill]] %s2386_s4 }
  0x96   : > { %602 = vrot.lane.b32.xlu0 %v368_v54, %s2120_s11  ;;  %s2392_s18 = sld [smem:[#allocation4 + $0x46]] }
  0x97   : > { %3836 = sst [smem:[#allocation57_spill]] %s2388_s28 }
  0x98   : > { %3822 = sst [smem:[#allocation43_spill]] %s2360_s23 }
  0x99   : > { %666 = vrot.lane.b32.xlu1 %v433_v55, %s2120_s11  ;;  %s2394_s29 = sld [smem:[#allocation4 + $0x39]] }
  0x9a   : > { %664 = vrot.lane.b32.xlu0 %v429_v52, %s2120_s11  ;;  %s2362_s11 = sld [smem:[#allocation4 + $0x6]] }
  0x9b   : > { %s2396_s17 = sld [smem:[#allocation4 + $0x1c]] }
  0x9c   : > { %s2398_s20 = sld [smem:[#allocation4 + $0xf]]  ;;  %v827_v19 = vstv %s2392_s18 }
  0x9d   : > { %942 = vrot.lane.b32.xlu1 %v372_v56, %s2121_s30  ;;  %s2400_s8 = sld [smem:[#allocation4 + $0x4d]]  ;;  %v2532_v32 = vmul.f32 %v827_v19, %v2324_v51 }
  0x9e   : > { %940 = vrot.lane.b32.xlu0 %v368_v54, %s2121_s30  ;;  %s2402_s24 = sld [smem:[#allocation4 + $0x40]] }
  0x9f   : > { %3837 = sst [smem:[#allocation58_spill]] %s2394_s29 }
  0xa0   : > { %3823 = sst [smem:[#allocation44_spill]] %s2362_s11 }
  0xa1   : > { %1004 = vrot.lane.b32.xlu1 %v433_v55, %s2121_s30  ;;  %3838 = sst [smem:[#allocation59_spill]] %s2396_s17 }
  0xa2   : > { %1002 = vrot.lane.b32.xlu0 %v429_v52, %s2121_s30  ;;  %s2374_s30 = sld [smem:[#allocation4 + $0xc]] }
  0xa3   : > { %3839 = sst [smem:[#allocation60_spill]] %s2398_s20 }
  0xa4   : > { %3840 = sst [smem:[#allocation61_spill]] %s2400_s8 }
  0xa5   : > { %1056 = vrot.lane.b32.xlu1 %v372_v56, %s2122_s0  ;;  %3841 = sst [smem:[#allocation62_spill]] %s2402_s24 }
  0xa6   : > { %1054 = vrot.lane.b32.xlu0 %v368_v54, %s2122_s0  ;;  %s2404_s15 = sld [smem:[#allocation4 + $0x23]] }
  0xa7   : > { %s2406_s4 = sld [smem:[#allocation4 + $0x16]] }
  0xa8   : > { %3829 = sst [smem:[#allocation50_spill]] %s2374_s30 }
  0xa9   : > { %1118 = vrot.lane.b32.xlu1 %v433_v55, %s2122_s0  ;;  %s2408_s28 = sld [smem:[#allocation4 + $0x47]] }
  0xaa   : > { %1116 = vrot.lane.b32.xlu0 %v429_v52, %s2122_s0  ;;  %s2390_s0 = sld [smem:[#allocation4 + $0x15]] }
  0xab   : > { %s2412_s30 = sld [smem:[#allocation4 + $0x54]] }
  0xac   : > { %3842 = sst [smem:[#allocation63_spill]] %s2404_s15 }
  0xad   : > { %1170 = vrot.lane.b32.xlu1 %v372_v56, %s2123_s16  ;;  %3843 = sst [smem:[#allocation64_spill]] %s2406_s4  ;;  %v2577_v56 = vrot.slane %v1167_v42, %v2320_v49 }
  0xae   : > { %1168 = vrot.lane.b32.xlu0 %v368_v54, %s2123_s16  ;;  %s2414_s19 = sld [smem:[#allocation4 + $0x2a]] }
  0xaf   : > { %3844 = sst [smem:[#allocation65_spill]] %s2408_s28 }
  0xb0   : > { %s2416_s29 = sld [smem:[#allocation4 + $0x5b]]  ;;  %v715_v15 = vstv %s2390_s0 }
  0xb1   : > { %1232 = vrot.lane.b32.xlu1 %v433_v55, %s2123_s16  ;;  %3846 = sst [smem:[#allocation67_spill]] %s2412_s30  ;;  %v2525_v29 = vmul.f32 %v715_v15, %v2328_v53 }
  0xb2   : > { %1230 = vrot.lane.b32.xlu0 %v429_v52, %s2123_s16  ;;  %s2410_s16 = sld [smem:[#allocation4 + $0x1d]] }
  0xb3   : > { %s2418_s17 = sld [smem:[#allocation4 + $0x4e]] }
  0xb4   : > { %3847 = sst [smem:[#allocation68_spill]] %s2414_s19 }
  0xb5   : > { %s2420_s20 = sld [smem:[#allocation4 + $0x3a]] }
  0xb6   : > { %3848 = sst [smem:[#allocation69_spill]] %s2416_s29 }
  0xb7   : > { %s2422_s8 = sld [smem:[#allocation4 + $0x24]] }
  0xb8   : > { %3845 = sst [smem:[#allocation66_spill]] %s2410_s16 }
  0xb9   : > { %3849 = sst [smem:[#allocation70_spill]] %s2418_s17 }
  0xba   : > { %s2424_s24 = sld [smem:[#allocation4 + $0x55]] }
  0xbb   : > { %3850 = sst [smem:[#allocation71_spill]] %s2420_s20 }
  0xbc   : > { %s2426_s15 = sld [smem:[#allocation4 + $0x2b]] }
  0xbd   : > { %3851 = sst [smem:[#allocation72_spill]] %s2422_s8 }
  0xbe   : > { %s2428_s4 = sld [smem:[#allocation4 + $0x5c]] }
  0xbf   : > { %s2430_s28 = sld [smem:[#allocation4 + $0x10]] }
  0xc0   : > { %3852 = sst [smem:[#allocation73_spill]] %s2424_s24 }
  0xc1   : > { %s2432_s16 = sld [smem:[#allocation4 + $0x41]] }
  0xc2   : > { %3853 = sst [smem:[#allocation74_spill]] %s2426_s15 }
  0xc3   : > { %s2434_s30 = sld [smem:[#allocation4 + $0x17]] }
  0xc4   : > { %3854 = sst [smem:[#allocation75_spill]] %s2428_s4 }
  0xc5   : > { %3855 = sst [smem:[#allocation76_spill]] %s2430_s28 }
  0xc6   : > { %s2436_s19 = sld [smem:[#allocation4 + $0x48]] }
  0xc7   : > { %3856 = sst [smem:[#allocation77_spill]] %s2432_s16 }
  0xc8   : > { %s2438_s29 = sld [smem:[#allocation4 + $0x3c]] }
  0xc9   : > { %s2440_s17 = sld [smem:[#allocation4 + $0x1e]]  ;;  %v747_v11 = vstv %s2434_s30 }
  0xca   : > { %s2442_s20 = sld [smem:[#allocation4 + $0x12]] }
  0xcb   : > { %s2444_s8 = sld [smem:[#allocation4 + $0x4f]] }
  0xcc   : > { %s2446_s24 = sld [smem:[#allocation4 + $0x43]]  ;;  %v859_v28 = vstv %s2436_s19 }
  0xcd   : > { %s2448_s4 = sld [smem:[#allocation4 + $0x25]]  ;;  %v2613_v15 = vmul.f32 %v859_v28, %v2324_v51 }
  0xce   : > { %3857 = sst [smem:[#allocation78_spill]] %s2438_s29 }
  0xcf   : > { %3858 = sst [smem:[#allocation79_spill]] %s2440_s17 }
  0xd0   : > { %3859 = sst [smem:[#allocation80_spill]] %s2442_s20 }
  0xd1   : > { %s2450_s28 = sld [smem:[#allocation4 + $0x56]] }
  0xd2   : > { %3860 = sst [smem:[#allocation81_spill]] %s2446_s24 }
  0xd3   : > { %3861 = sst [smem:[#allocation82_spill]] %s2448_s4 }
  0xd4   : > { %s2452_s16 = sld [smem:[#allocation4 + $0x19]] }
  0xd5   : > { %s2454_s15 = sld [smem:[#allocation4 + $0x2c]] }
  0xd6   : > { %s2456_s29 = sld [smem:[#allocation4 + $0x4a]] }
  0xd7   : > { %3862 = sst [smem:[#allocation83_spill]] %s2450_s28 }
  0xd8   : > { %s2458_s20 = sld [smem:[#allocation4 + $0x5d]] }
  0xd9   : > { %s2460_s24 = sld [smem:[#allocation4 + $0x20]] }
  0xda   : > { %s2462_s4 = sld [smem:[#allocation4 + $0x51]]  ;;  %v779_v19 = vstv %s2452_s16 }
  0xdb   : > { %s2464_s28 = sld [smem:[#allocation4 + $0x3d]]  ;;  %v2636_v45 = vmul.f32 %v779_v19, %v2328_v53 }
  0xdc   : > { %s2497_s26 = sld [smem:[#allocation4 + $0x1a]]  ;;  %v891_v48 = vstv %s2456_s29 }
  0xdd   : > { %s2503_s6 = sld [smem:[#allocation4 + $0x4b]]  ;;  %3908 = vst [vmem:[#allocation91_spill] sm:$0xff] %v2636_v45 }
  0xde   : > { %3863 = sst [smem:[#allocation84_spill]] %s2458_s20 }
  0xdf   : > { %3864 = sst [smem:[#allocation85_spill]] %s2460_s24 }
  0xe0   : > { %3865 = sst [smem:[#allocation86_spill]] %s2462_s4 }
  0xe1   : > { %3866 = sst [smem:[#allocation87_spill]] %s2464_s28 }
  0xe2   : > { %s2475_s20 = sld [smem:[#allocation4 + $0x13]]  ;;  %v795_v54 = vstv %s2497_s26 }
  0xe3   : > { %s2481_s28 = sld [smem:[#allocation4 + $0x44]]  ;;  %v907_v42 = vstv %s2503_s6  ;;  %v2668_v19 = vmul.f32 %v795_v54, %v2328_v53 }
  0xe4   : > { %s2487_s4 = sld [smem:[#allocation4 + $0x27]] }
  0xe5   : > { %s2509_s14 = sld [smem:[#allocation4 + $0x58]]  ;;  %3915 = vst [vmem:[#allocation93_spill] sm:$0xff] %v2668_v19 }
  0xe6   : > { %s3873_s13 = sld [smem:[#allocation64_spill]] }
  0xe7   : > { %s3875_s0 = sld [smem:[#allocation65_spill]] }
  0xe8   : > { %s2517_s23 = sld [smem:[#allocation4 + $0x2e]] }
  0xe9   : > { %3867 = sst [smem:[#allocation88_spill]] %s2481_s28 }
  0xea   : > { %s2527_s22 = sld [smem:[#allocation4 + $0x5f]] }
  0xeb   : > { %s2535_s7 = sld [smem:[#allocation4 + $0x21]] }
  0xec   : > { %v731_v33 = vstv %s3873_s13  ;;  %s2545_s27 = sld [smem:[#allocation4 + $0x52]] }
  0xed   : > { %v843_v38 = vstv %s3875_s0  ;;  %s2555_s5 = sld [smem:[#allocation4 + $0x3e]]  ;;  %v2562_v47 = vmul.f32 %v731_v33, %v2328_v53  ;;  %v2605_v33 = vmul.f32 %v747_v11, %v2328_v53  ;;  %v2678_v11 = vmul.f32 %v907_v42, %v2324_v51 }
  0xee   : > { %s2564_s1 = sld [smem:[#allocation4 + $0x14]]  ;;  %v2572_v55 = vmul.f32 %v843_v38, %v2324_v51  ;;  %v2644_v38 = vmul.f32 %v891_v48, %v2324_v51 }
  0xef   : > { %s2574_s2 = sld [smem:[#allocation4 + $0x28]]  ;;  %3917 = vst [vmem:[#allocation95_spill] sm:$0xff] %v2678_v11 }
  0xf0   : > { %s2584_s25 = sld [smem:[#allocation4 + $0x45]]  ;;  %3910 = vst [vmem:[#allocation92_spill] sm:$0xff] %v2644_v38 }
  0xf1   : > { %s2598_s30 = sld [smem:[#allocation4 + $0x2f]] }
  0xf2   : > { %s3896_s9 = sld [smem:[#allocation73_spill]] }
  0xf3   : > { %3882 = sst [smem:[#allocation64_spill]] %s2555_s5 }
  0xf4   : > { %3885 = sst [smem:[#allocation65_spill]] %s2564_s1 }
  0xf5   : > { %3889 = sst [smem:[#allocation89_spill]] %s2574_s2 }
  0xf6   : > { %3892 = sst [smem:[#allocation90_spill]] %s2584_s25 }
  0xf7   : > { %s2591_s2 = sld [smem:[#allocation4 + $0x59]] }
  0xf8   : > { %s3897_s13 = sld [smem:[#allocation74_spill]]  ;;  %v376_v26 = vpop.permute.xlu0 %375 }
  0xf9   : > { %s2607_s18 = sld [smem:[#allocation4 + $0x60]] }
  0xfa   : > { %s2616_s10 = sld [smem:[#allocation4 + $0x1b]] }
  0xfb   : > { %s2623_s11 = sld [smem:[#allocation4 + $0x4c]] }
  0xfc   : > { %s2629_s16 = sld [smem:[#allocation4 + $0x22]]  ;;  %v378_v39 = vpop.permute.xlu0 %377 }
  0xfd   : > { %s3906_s1 = sld [smem:[#allocation83_spill]]  ;;  %v382_v30 = vsel %vm381_vm2, %v376_v26, %v378_v39 }
  0xfe   : > { %s2638_s5 = sld [smem:[#allocation4 + $0x18]]  ;;  %v396_v31 = vmul.f32 %v2473_v60, %v382_v30 }
  0xff   : > { %3900 = sst [smem:[#allocation73_spill]] %s2607_s18 }
 0x100   : > { %s3905_s18 = sld [smem:[#allocation82_spill]]  ;;  %v811_v61 = vstv %s2616_s10  ;;  %v412_v17 = vmul.f32 %v410_v12, %v396_v31 }
 0x101   : > { %s2647_s21 = sld [smem:[#allocation4 + $0x49]]  ;;  %v923_v48 = vstv %s2623_s11  ;;  %v2707_v42 = vmul.f32 %v811_v61, %v2328_v53  ;;  %v437_v61 = vpop.permute.xlu1 %436 }
 0x102   : > { %3904 = sst [smem:[#allocation74_spill]] %s2629_s16  ;;  %v2717_v52 = vmul.f32 %v923_v48, %v2324_v51 }
 0x103   : > { %s2654_s19 = sld [smem:[#allocation4 + $0x53]]  ;;  %3925 = vst [vmem:[#allocation99_spill] sm:$0xff] %v2707_v42 }
 0x104   : > { %s2661_s26 = sld [smem:[#allocation4 + $0x1f]]  ;;  %v763_v24 = vstv %s2638_s5  ;;  %3927 = vst [vmem:[#allocation100_spill] sm:$0xff] %v2717_v52 }
 0x105   : > { %s2670_s6 = sld [smem:[#allocation4 + $0x29]]  ;;  %v2726_v44 = vmul.f32 %v763_v24, %v2328_v53 }
 0x106   : > { %s2680_s29 = sld [smem:[#allocation4 + $0x5a]] }
 0x107   : > { %s2688_s12 = sld [smem:[#allocation4 + $0x30]]  ;;  %v875_v46 = vstv %s2647_s21  ;;  %3928 = vst [vmem:[#allocation101_spill] sm:$0xff] %v2726_v44 }
 0x108   : > { %s2694_s3 = sld [smem:[#allocation4 + $0x61]]  ;;  %v2734_v37 = vmul.f32 %v875_v46, %v2324_v51  ;;  %v439_v51 = vpop.permute.xlu1 %438 }
 0x109   : > { %3912 = sst [smem:[#allocation82_spill]] %s2654_s19  ;;  %v440_v43 = vsel %vm381_vm2, %v437_v61, %v439_v51  ;;  %v441_v25 = vsel %vm381_vm2, %v439_v51, %v437_v61  ;;  %v383_v61 = vsel %vm381_vm2, %v378_v39, %v376_v26 }
 0x10a   : > { %3914 = sst [smem:[#allocation83_spill]] %s2661_s26  ;;  %3930 = vst [vmem:[#allocation102_spill] sm:$0xff] %v2734_v37  ;;  %v442_v53 = vmul.f32 %v441_v25, %v2470_v59  ;;  %v443_v24 = vmul.f32 %v440_v43, %v2473_v60  ;;  %v395_v25 = vmul.f32 %v2470_v59, %v383_v61  ;;  %v489_v59 = vpop.permute.xlu0 %488 }
 0x10b   : > { %3916 = sst [smem:[#allocation94_spill]] %s2670_s6 }
 0x10c   : > { %3918 = sst [smem:[#allocation96_spill]] %s2680_s29  ;;  %v491_v43 = vpop.permute.xlu1 %490  ;;  %v446_v39 = vmul.f32 %v445_v62, %v442_v53  ;;  %v447_v46 = vmul.f32 %v445_v62, %v443_v24  ;;  %v2783_v28 = vmul.f32 %v451_v63, %v442_v53  ;;  %v2788_v61 = vmul.f32 %v451_v63, %v443_v24 }
 0x10d   : > { %3919 = sst [smem:[#allocation97_spill]] %s2688_s12  ;;  %v2792_v26 = vmul.f32 %v457_v1, %v442_v53  ;;  %v2796_v54 = vmul.f32 %v457_v1, %v443_v24  ;;  %v464_v62 = vmul.f32 %v463_v2, %v442_v53  ;;  %v465_v48 = vmul.f32 %v463_v2, %v443_v24 }
 0x10e   : > { %3920 = sst [smem:[#allocation98_spill]] %s2694_s3  ;;  %v2804_v60 = vmul.f32 %v469_v0, %v442_v53  ;;  %v2808_v63 = vmul.f32 %v469_v0, %v443_v24  ;;  %v2812_v30 = vmul.f32 %v475_v3, %v442_v53  ;;  %v2817_v1 = vmul.f32 %v475_v3, %v443_v24  ;;  %v551_v3 = vpop.permute.xlu0 %550 }
 0x10f   : > { %s3921_s24 = sld [smem:[#allocation64_spill]]  ;;  %v2821_v51 = vmul.f32 %v481_v5, %v442_v53  ;;  %v2825_v2 = vmul.f32 %v481_v5, %v443_v24  ;;  %v399_v22 = vmul.f32 %v398_v6, %v395_v25  ;;  %v400_v0 = vmul.f32 %v398_v6, %v396_v31 }
 0x110   : > { %s3922_s0 = sld [smem:[#allocation65_spill]]  ;;  %3943 = vst [vmem:[#allocation103_spill] sm:$0xff] %v2812_v30  ;;  %3944 = vst [vmem:[#allocation104_spill] sm:$0xff] %v2817_v1  ;;  %v553_v20 = vpop.permute.xlu1 %552  ;;  %v2833_v18 = vmul.f32 %v402_v7, %v395_v25  ;;  %v411_v21 = vmul.f32 %v410_v12, %v395_v25  ;;  %v2841_v53 = vmul.f32 %v402_v7, %v396_v31 }
 0x111   : > { %s2701_s17 = sld [smem:[#allocation4 + $0x50]]  ;;  %3945 = vst [vmem:[#allocation105_spill] sm:$0xff] %v2821_v51  ;;  %3946 = vst [vmem:[#allocation106_spill] sm:$0xff] %v2825_v2  ;;  %v2845_v5 = vmul.f32 %v406_v8, %v395_v25  ;;  %v2849_v6 = vmul.f32 %v406_v8, %v396_v31  ;;  %v2853_v24 = vmul.f32 %v3754_v13, %v395_v25 }
 0x112   : > { %s3924_s10 = sld [smem:[#allocation89_spill]]  ;;  %v466_v16 = vadd.f32 %v464_v62, %v411_v21  ;;  %v467_v12 = vadd.f32 %v465_v48, %v412_v17  ;;  %v493_v14 = vsel %vm492_vm3, %v489_v59, %v491_v43  ;;  %v494_v7 = vsel %vm492_vm3, %v491_v43, %v489_v59 }
 0x113   : > { %s2710_s11 = sld [smem:[#allocation4 + $0x26]]  ;;  %v2860_v4 = vmul.f32 %v2492_v9, %v494_v7  ;;  %v2863_v8 = vmul.f32 %v2495_v10, %v493_v14  ;;  %v554_v13 = vsel %vm492_vm3, %v551_v3, %v553_v20  ;;  %v555_v17 = vsel %vm492_vm3, %v553_v20, %v551_v3  ;;  %v603_v20 = vpop.permute.xlu0 %602 }
 0x114   : > { %s3926_s5 = sld [smem:[#allocation73_spill]]  ;;  %v605_v21 = vpop.permute.xlu1 %604  ;;  %v2891_v44 = vmul.f32 %v555_v17, %v2492_v9 }
 0x115   : > { %s2719_s28 = sld [smem:[#allocation4 + $0x57]]  ;;  %v607_v30 = vsel %vm606_vm4, %v603_v20, %v605_v21 }
 0x116   : > { %s2728_s21 = sld [smem:[#allocation4 + $0x2d]] }
 0x117   : > { %3923 = sst [smem:[#allocation64_spill]] %s2701_s17 }
 0x118   : > { %s3942_s6 = sld [smem:[#allocation42_spill]] }
 0x119   : > { %s3947_s25 = sld [smem:[#allocation43_spill]] }
 0x11a   : > { %s3948_s3 = sld [smem:[#allocation44_spill]] }
 0x11b   : > { %s3949_s17 = sld [smem:[#allocation45_spill]] }
 0x11c   : > { %3929 = sst [smem:[#allocation65_spill]] %s2728_s21 }
 0x11d   : > { %s3950_s12 = sld [smem:[#allocation48_spill]] }
 0x11e   : > { %s3951_s16 = sld [smem:[#allocation46_spill]]  ;;  %v3952_v48 = vstv %s3942_s6 }
 0x11f   : > { %v2872_v43 = vmul.f32 %v3952_v48, %v396_v31  ;;  %v3953_v59 = vstv %s3947_s25  ;;  %s3954_s29 = sld [smem:[#allocation47_spill]]  ;;  %v2894_v48 = vmul.f32 %v554_v13, %v2495_v10 }
 0x120   : > { %v2876_v14 = vmul.f32 %v3953_v59, %v395_v25  ;;  %v3956_v62 = vmov %v3953_v59  ;;  %v3958_v36 = vstv %s3948_s3  ;;  %s3962_s26 = sld [smem:[#allocation49_spill]]  ;;  %v449_v59 = vadd.f32 %v447_v46, %v400_v0 }
 0x121   : > { %v2880_v7 = vmul.f32 %v3956_v62, %v396_v31  ;;  %v2884_v37 = vmul.f32 %v3958_v36, %v395_v25  ;;  %v3960_v3 = vmov %v3958_v36  ;;  %s3963_s21 = sld [smem:[#allocation52_spill]]  ;;  %v3964_v62 = vstv %s3949_s17 }
 0x122   : > { %3955 = vst [vmem:[#allocation107_spill] sm:$0xff] %v2876_v14  ;;  %v2888_v52 = vmul.f32 %v3960_v3, %v396_v31  ;;  %v510_v42 = vmul.f32 %v3964_v62, %v2860_v4  ;;  %v448_v3 = vadd.f32 %v446_v39, %v399_v22  ;;  %s3975_s19 = sld [smem:[#allocation53_spill]] }
 0x123   : > { %3957 = vst [vmem:[#allocation108_spill] sm:$0xff] %v2880_v7  ;;  %3959 = vst [vmem:[#allocation109_spill] sm:$0xff] %v2884_v37  ;;  %v3965_v36 = vstv %s3950_s12  ;;  %v3967_v37 = vmov %v3964_v62  ;;  %s3977_s6 = sld [smem:[#allocation54_spill]] }
 0x124   : > { %3961 = vst [vmem:[#allocation110_spill] sm:$0xff] %v2888_v52  ;;  %v528_v25 = vmul.f32 %v3965_v36, %v2860_v4  ;;  %v3966_v51 = vmov %v3965_v36  ;;  %v511_v9 = vmul.f32 %v3967_v37, %v2863_v8  ;;  %v3968_v17 = vstv %s3951_s16  ;;  %v667_v36 = vpop.permute.xlu1 %666  ;;  %v665_v52 = vpop.permute.xlu0 %664  ;;  %s3978_s25 = sld [smem:[#allocation50_spill]] }
 0x125   : > { %v529_v31 = vmul.f32 %v3966_v51, %v2863_v8  ;;  %v2911_v10 = vmul.f32 %v3968_v17, %v2860_v4  ;;  %v3969_v13 = vmov %v3968_v17  ;;  %v3970_v0 = vstv %s3954_s29  ;;  %s3979_s3 = sld [smem:[#allocation56_spill]] }
 0x126   : > { %v2916_v46 = vmul.f32 %v3969_v13, %v2863_v8  ;;  %v2921_v62 = vmul.f32 %v3970_v0, %v2860_v4  ;;  %v3971_v51 = vmov %v3970_v0  ;;  %v530_v39 = vadd.f32 %v528_v25, %v466_v16  ;;  %s3982_s17 = sld [smem:[#allocation55_spill]] }
 0x127   : > { %v2926_v22 = vmul.f32 %v3971_v51, %v2863_v8  ;;  %v531_v37 = vadd.f32 %v529_v31, %v467_v12  ;;  %v3972_v2 = vstv %s3962_s26  ;;  %v3974_v13 = vstv %s3963_s21  ;;  %s3984_s12 = sld [smem:[#allocation57_spill]] }
 0x128   : > { %v2931_v17 = vmul.f32 %v3972_v2, %v2860_v4  ;;  %v578_v11 = vmul.f32 %v3974_v13, %v2891_v44  ;;  %v3976_v0 = vmov %v3974_v13  ;;  %v608_v16 = vsel %vm606_vm4, %v605_v21, %v603_v20  ;;  %v941_v1 = vpop.permute.xlu0 %940  ;;  %s3994_s16 = sld [smem:[#allocation51_spill]] }
 0x129   : > { %v579_v19 = vmul.f32 %v3976_v0, %v2894_v48  ;;  %v2944_v2 = vmul.f32 %v2515_v23, %v608_v16  ;;  %v2947_v12 = vmul.f32 %v2522_v27, %v607_v30  ;;  %v668_v25 = vsel %vm606_vm4, %v665_v52, %v667_v36  ;;  %v943_v0 = vpop.permute.xlu1 %942  ;;  %s3997_s29 = sld [smem:[#allocation58_spill]] }
 0x12a   : > { %3973 = vst [vmem:[#allocation111_spill] sm:$0xff] %v2931_v17  ;;  %v669_v31 = vsel %vm606_vm4, %v667_v36, %v665_v52  ;;  %v3980_v21 = vstv %s3962_s26  ;;  %v2963_v30 = vmul.f32 %v668_v25, %v2522_v27  ;;  %v580_v16 = vadd.f32 %v578_v11, %v530_v39  ;;  %s4000_s26 = sld [smem:[#allocation60_spill]] }
 0x12b   : > { %v2957_v20 = vmul.f32 %v3980_v21, %v2863_v8  ;;  %v581_v51 = vadd.f32 %v579_v19, %v531_v37  ;;  %v2960_v13 = vmul.f32 %v669_v31, %v2515_v23  ;;  %v3981_v14 = vstv %s3975_s19  ;;  %s4003_s21 = sld [smem:[#allocation59_spill]] }
 0x12c   : > { %v642_v52 = vmul.f32 %v3981_v14, %v2944_v2  ;;  %v3983_v36 = vmov %v3981_v14  ;;  %v3985_v21 = vstv %s3977_s6  ;;  %v3986_v23 = vstv %s3978_s25  ;;  %s4006_s19 = sld [smem:[#allocation62_spill]] }
 0x12d   : > { %v643_v38 = vmul.f32 %v3983_v36, %v2947_v12  ;;  %v561_v19 = vmul.f32 %v3985_v21, %v2894_v48  ;;  %v2977_v37 = vmul.f32 %v3986_v23, %v2860_v4  ;;  %v3988_v27 = vstv %s3979_s3  ;;  %s4010_s25 = sld [smem:[#allocation66_spill]] }
 0x12e   : > { %v692_v25 = vmul.f32 %v3988_v27, %v2960_v13  ;;  %v3989_v11 = vmov %v3988_v27  ;;  %v513_v14 = vadd.f32 %v511_v9, %v449_v59  ;;  %v3990_v31 = vmov %v3986_v23  ;;  %s4014_s3 = sld [smem:[#allocation70_spill]] }
 0x12f   : > { %3987 = vst [vmem:[#allocation112_spill] sm:$0xff] %v2977_v37  ;;  %v693_v39 = vmul.f32 %v3989_v11, %v2963_v30  ;;  %v2988_v7 = vmul.f32 %v3990_v31, %v2863_v8  ;;  %v644_v36 = vadd.f32 %v642_v52, %v580_v16  ;;  %v645_v45 = vadd.f32 %v643_v38, %v581_v51  ;;  %v1005_v37 = vpop.permute.xlu1 %1004  ;;  %v1003_v38 = vpop.permute.xlu0 %1002 }
 0x130   : > { %v945_v21 = vsel %vm944_vm5, %v941_v1, %v943_v0  ;;  %v946_v23 = vsel %vm944_vm5, %v943_v0, %v941_v1  ;;  %v563_v27 = vadd.f32 %v561_v19, %v513_v14  ;;  %v3992_v17 = vstv %s3982_s17 }
 0x131   : > { %3991 = vst [vmem:[#allocation113_spill] sm:$0xff] %v2988_v7  ;;  %v625_v11 = vmul.f32 %v3992_v17, %v2947_v12  ;;  %v3993_v59 = vstv %s3984_s12  ;;  %v3000_v31 = vadd.f32 %v692_v25, %v644_v36  ;;  %v3002_v16 = vadd.f32 %v693_v39, %v645_v45  ;;  %s4019_s12 = sld [smem:[#allocation72_spill]] }
 0x132   : > { %v675_v9 = vmul.f32 %v3993_v59, %v2963_v30  ;;  %v512_v51 = vadd.f32 %v510_v42, %v448_v3  ;;  %v3998_v52 = vstv %s3977_s6  ;;  %v1006_v0 = vsel %vm944_vm5, %v1003_v38, %v1005_v37  ;;  %s4008_s6 = sld [smem:[#allocation61_spill]] }
 0x133   : > { %3995 = vst [vmem:[#allocation114_spill] sm:$0xff] %v3000_v31  ;;  %3996 = vst [vmem:[#allocation115_spill] sm:$0xff] %v3002_v16  ;;  %v560_v1 = vmul.f32 %v3998_v52, %v2891_v44  ;;  %v1007_v17 = vsel %vm944_vm5, %v1005_v37, %v1003_v38  ;;  %v627_v19 = vadd.f32 %v625_v11, %v563_v27  ;;  %v3999_v14 = vstv %s3982_s17  ;;  %v1057_v27 = vpop.permute.xlu1 %1056  ;;  %s4016_s17 = sld [smem:[#allocation63_spill]] }
 0x134   : > { %v624_v25 = vmul.f32 %v3999_v14, %v2944_v2  ;;  %v3015_v45 = vmul.f32 %v2538_v34, %v945_v21  ;;  %v3018_v39 = vmul.f32 %v2541_v35, %v946_v23  ;;  %v4001_v3 = vmov %v3993_v59 }
 0x135   : > { %v562_v42 = vadd.f32 %v560_v1, %v512_v51  ;;  %v674_v36 = vmul.f32 %v4001_v3, %v2960_v13  ;;  %v4002_v59 = vstv %s3994_s16  ;;  %v677_v11 = vadd.f32 %v675_v9, %v627_v19  ;;  %v1055_v1 = vpop.permute.xlu0 %1054 }
 0x136   : > { %v3027_v37 = vmul.f32 %v4002_v59, %v2860_v4  ;;  %v455_v21 = vadd.f32 %v2788_v61, %v2841_v53  ;;  %v4005_v23 = vstv %s3997_s29  ;;  %v3035_v52 = vmul.f32 %v1006_v0, %v2538_v34 }
 0x137   : > { %v567_v38 = vmul.f32 %v4005_v23, %v2894_v48  ;;  %v3038_v51 = vmul.f32 %v1007_v17, %v2541_v35  ;;  %v626_v14 = vadd.f32 %v624_v25, %v562_v42  ;;  %v4007_v4 = vstv %s4000_s26 }
 0x138   : > { %4004 = vst [vmem:[#allocation116_spill] sm:$0xff] %v3027_v37  ;;  %v631_v3 = vmul.f32 %v4007_v4, %v2947_v12  ;;  %v1059_v9 = vsel %vm1058_vm6, %v1055_v1, %v1057_v27  ;;  %v1060_v61 = vsel %vm1058_vm6, %v1057_v27, %v1055_v1  ;;  %v4009_v34 = vrot.slane %v2525_v29, %v2322_v50  ;;  %v1119_v27 = vpop.permute.xlu1 %1118 }
 0x139   : > { %v519_v53 = vadd.f32 %v2916_v46, %v455_v21  ;;  %v3052_v0 = vmul.f32 %v2549_v40, %v1059_v9  ;;  %v4011_v17 = vstv %s4003_s21  ;;  %v676_v25 = vadd.f32 %v674_v36, %v626_v14  ;;  %v1117_v9 = vpop.permute.xlu0 %1116  ;;  %s4022_s21 = sld [smem:[#allocation67_spill]] }
 0x13a   : > { %v729_v35 = vadd.f32 %v4009_v34, %v677_v11  ;;  %v963_v19 = vmul.f32 %v4011_v17, %v3018_v39  ;;  %v4012_v42 = vmov %v4011_v17  ;;  %v3061_v23 = vmul.f32 %v2552_v41, %v1060_v61 }
 0x13b   : > { %v962_v59 = vmul.f32 %v4012_v42, %v3015_v45  ;;  %v4013_v1 = vrot.slane %v2532_v32, %v2322_v50  ;;  %v569_v46 = vadd.f32 %v567_v38, %v519_v53  ;;  %v4015_v21 = vstv %s4006_s19 }
 0x13c   : > { %v681_v4 = vmul.f32 %v4015_v21, %v2963_v30  ;;  %v4017_v36 = vstv %s4008_s6  ;;  %v4018_v61 = vrot.slane %v2525_v29, %v2320_v49  ;;  %v1120_v53 = vsel %vm1058_vm6, %v1117_v9, %v1119_v27  ;;  %v1171_v31 = vpop.permute.xlu1 %1170  ;;  %s4029_s6 = sld [smem:[#allocation68_spill]] }
 0x13d   : > { %v841_v11 = vadd.f32 %v4013_v1, %v729_v35  ;;  %v1013_v14 = vmul.f32 %v4017_v36, %v3038_v51  ;;  %v4020_v17 = vmov %v4017_v36  ;;  %v4021_v35 = vstv %s4010_s25 }
 0x13e   : > { %v728_v34 = vadd.f32 %v4018_v61, %v676_v25  ;;  %v1012_v42 = vmul.f32 %v4020_v17, %v3035_v52  ;;  %v969_v38 = vmul.f32 %v4021_v35, %v3018_v39  ;;  %v1121_v1 = vsel %vm1058_vm6, %v1119_v27, %v1117_v9 }
 0x13f   : > { %v965_v21 = vadd.f32 %v963_v19, %v841_v11  ;;  %v633_v36 = vadd.f32 %v631_v3, %v569_v46  ;;  %v3086_v16 = vmul.f32 %v1120_v53, %v2549_v40  ;;  %v3089_v29 = vmul.f32 %v1121_v1, %v2552_v41  ;;  %v1169_v46 = vpop.permute.xlu0 %1168 }
 0x140   : > { %v4023_v25 = vrot.slane %v2532_v32, %v2320_v49  ;;  %v4024_v17 = vstv %s4014_s3  ;;  %v4025_v27 = vstv %s4016_s17  ;;  %v4027_v11 = vstv %s4019_s12  ;;  %s3146_s17 = sld [smem:[#allocation4 + $0x5e]] }
 0x141   : > { %v1019_v35 = vmul.f32 %v4024_v17, %v3038_v51  ;;  %v1077_v9 = vmul.f32 %v4025_v27, %v3061_v23  ;;  %v4026_v3 = vmov %v4025_v27  ;;  %v683_v19 = vadd.f32 %v681_v4, %v633_v36 }
 0x142   : > { %v840_v61 = vadd.f32 %v4023_v25, %v728_v34  ;;  %v1076_v40 = vmul.f32 %v4026_v3, %v3052_v0  ;;  %v1083_v41 = vmul.f32 %v4027_v11, %v3061_v23  ;;  %v1015_v53 = vadd.f32 %v1013_v14, %v965_v21  ;;  %v1233_v11 = vpop.permute.xlu1 %1232 }
 0x143   : > { %v454_v34 = vadd.f32 %v2783_v28, %v2833_v18  ;;  %v4028_v1 = vstv %s3997_s29  ;;  %v1173_v17 = vsel %vm1172_vm7, %v1169_v46, %v1171_v31  ;;  %v1174_v4 = vsel %vm1172_vm7, %v1171_v31, %v1169_v46  ;;  %s4038_s29 = sld [smem:[#allocation69_spill]] }
 0x144   : > { %v964_v32 = vadd.f32 %v962_v59, %v840_v61  ;;  %v566_v25 = vmul.f32 %v4028_v1, %v2891_v44  ;;  %v4030_v36 = vstv %s4022_s21  ;;  %v4031_v59 = vrot.slane %v2562_v47, %v2322_v50  ;;  %s4053_s21 = sld [smem:[#allocation79_spill]] }
 0x145   : > { %v1127_v14 = vmul.f32 %v4030_v36, %v3089_v29  ;;  %v3122_v18 = vmul.f32 %v2577_v56, %v1173_v17  ;;  %v3125_v28 = vmul.f32 %v2580_v57, %v1174_v4  ;;  %v4032_v27 = vmov %v4030_v36 }
 0x146   : > { %v745_v21 = vadd.f32 %v4031_v59, %v683_v19  ;;  %v1014_v61 = vadd.f32 %v1012_v42, %v964_v32  ;;  %v1126_v3 = vmul.f32 %v4032_v27, %v3086_v16  ;;  %v1079_v31 = vadd.f32 %v1077_v9, %v1015_v53  ;;  %v1231_v59 = vpop.permute.xlu0 %1230 }
 0x147   : > { %v4033_v46 = vrot.slane %v2572_v55, %v2322_v50  ;;  %v518_v36 = vadd.f32 %v2911_v10, %v454_v34  ;;  %v4034_v19 = vstv %s4000_s26  ;;  %v4035_v4 = vstv %s4029_s6  ;;  %s4041_s26 = sld [smem:[#allocation75_spill]] }
 0x148   : > { %v630_v17 = vmul.f32 %v4034_v19, %v2944_v2  ;;  %v1191_v42 = vmul.f32 %v4035_v4, %v3125_v28  ;;  %v1078_v32 = vadd.f32 %v1076_v40, %v1014_v61  ;;  %v4036_v27 = vmov %v4035_v4  ;;  %s4070_s6 = sld [smem:[#allocation80_spill]] }
 0x149   : > { %v857_v1 = vadd.f32 %v4033_v46, %v745_v21  ;;  %v1190_v37 = vmul.f32 %v4036_v27, %v3122_v18  ;;  %v4037_v9 = vstv %s4006_s19  ;;  %v1234_v10 = vsel %vm1172_vm7, %v1231_v59, %v1233_v11  ;;  %s4042_s19 = sld [smem:[#allocation71_spill]] }
 0x14a   : > { %v680_v53 = vmul.f32 %v4037_v9, %v2960_v13  ;;  %v1235_v34 = vsel %vm1172_vm7, %v1233_v11, %v1231_v59  ;;  %v568_v46 = vadd.f32 %v566_v25, %v518_v36  ;;  %v3153_v40 = vmul.f32 %v1234_v10, %v2577_v56 }
 0x14b   : > { %v971_v21 = vadd.f32 %v969_v38, %v857_v1  ;;  %v3156_v61 = vmul.f32 %v1235_v34, %v2580_v57  ;;  %v1129_v19 = vadd.f32 %v1127_v14, %v1079_v31  ;;  %v1128_v4 = vadd.f32 %v1126_v3, %v1078_v32 }
 0x14c   : > { %v4039_v27 = vstv %s3994_s16  ;;  %v4040_v11 = vstv %s3896_s9  ;;  %v632_v25 = vadd.f32 %v630_v17, %v568_v46  ;;  %v4043_v56 = vstv %s4038_s29  ;;  %s4046_s16 = sld [smem:[#allocation76_spill]] }
 0x14d   : > { %v3161_v9 = vmul.f32 %v4039_v27, %v2863_v8  ;;  %v1021_v7 = vadd.f32 %v1019_v35, %v971_v21  ;;  %v1133_v38 = vmul.f32 %v4040_v11, %v3089_v29  ;;  %v1193_v1 = vadd.f32 %v1191_v42, %v1129_v19  ;;  %s4074_s29 = sld [smem:[#allocation81_spill]] }
 0x14e   : > { %v1241_v36 = vmul.f32 %v4043_v56, %v3156_v61  ;;  %v1192_v57 = vadd.f32 %v1190_v37, %v1128_v4  ;;  %v4044_v14 = vmov %v4043_v56  ;;  %v4045_v8 = vstv %s3897_s13  ;;  %s2125_s13 = smov 2  }
 0x14f   : > { %v1240_v31 = vmul.f32 %v4044_v14, %v3153_v40  ;;  %v1085_v3 = vadd.f32 %v1083_v41, %v1021_v7  ;;  %v1197_v59 = vmul.f32 %v4045_v8, %v3125_v28  ;;  %v682_v35 = vadd.f32 %v680_v53, %v632_v25 }
 0x150   : > { %v4047_v32 = vstv %s4010_s25  ;;  %v1243_v10 = vadd.f32 %v1241_v36, %v1193_v1  ;;  %v4048_v34 = vstv %s4014_s3  ;;  %v461_v21 = vadd.f32 %v2796_v54, %v2849_v6  ;;  %s4051_s25 = sld [smem:[#allocation77_spill]]  ;;  %s2124_s3 = smov 3  }
 0x151   : > { %v968_v17 = vmul.f32 %v4047_v32, %v3015_v45  ;;  %v1242_v42 = vadd.f32 %v1240_v31, %v1192_v57  ;;  %v1018_v37 = vmul.f32 %v4048_v34, %v3035_v52  ;;  %v1135_v7 = vadd.f32 %v1133_v38, %v1085_v3 }
 0x152   : > { %v4049_v41 = vstv %s4041_s26  ;;  %v4050_v53 = vrot.slane %v2562_v47, %v2320_v49  ;;  %v4052_v4 = vstv %s4042_s19  ;;  %1282 = vrot.lane.b32.xlu1 %v1243_v10, %s2124_s3  ;;  %v4054_v11 = vstv %s4019_s12  ;;  %s4062_s12 = sld [smem:[#allocation84_spill]] }
 0x153   : > { %v1247_v46 = vmul.f32 %v4049_v41, %v3156_v61  ;;  %v573_v27 = vmul.f32 %v4052_v4, %v2894_v48  ;;  %1280 = vrot.lane.b32.xlu0 %v1242_v42, %s2124_s3  ;;  %v1082_v54 = vmul.f32 %v4054_v11, %v3052_v0  ;;  %v525_v6 = vadd.f32 %v2926_v22, %v461_v21  ;;  %s4077_s26 = sld [smem:[#allocation85_spill]] }
 0x154   : > { %v744_v19 = vadd.f32 %v4050_v53, %v682_v35  ;;  %v4055_v38 = vstv %s4046_s16  ;;  %v1257_v47 = vstv %s3146_s17  ;;  %v1199_v1 = vadd.f32 %v1197_v59, %v1135_v7  ;;  %s4080_s19 = sld [smem:[#allocation86_spill]] }
 0x155   : > { %v637_v25 = vmul.f32 %v4055_v38, %v2947_v12  ;;  %v4056_v56 = vrot.slane %v2572_v55, %v2320_v49  ;;  %v4057_v57 = vstv %s3896_s9  ;;  %v4058_v31 = vmov %v4045_v8  ;;  %s4066_s9 = sld [smem:[#allocation78_spill]] }
 0x156   : > { %v1132_v14 = vmul.f32 %v4057_v57, %v3086_v16  ;;  %v1196_v3 = vmul.f32 %v4058_v31, %v3122_v18  ;;  %v4059_v22 = vmov %v4049_v41  ;;  %v575_v35 = vadd.f32 %v573_v27, %v525_v6 }
 0x157   : > { %v856_v36 = vadd.f32 %v4056_v56, %v744_v19  ;;  %v1246_v8 = vmul.f32 %v4059_v22, %v3153_v40  ;;  %v4060_v32 = vstv %s4051_s25  ;;  %v4061_v59 = vstv %s4053_s21 }
 0x158   : > { %v687_v10 = vmul.f32 %v4060_v32, %v2963_v30  ;;  %v975_v42 = vmul.f32 %v4061_v59, %v3018_v39  ;;  %v1249_v55 = vadd.f32 %v1247_v46, %v1199_v1  ;;  %v460_v21 = vadd.f32 %v2792_v26, %v2845_v5 }
 0x159   : > { %v970_v34 = vadd.f32 %v968_v17, %v856_v36  ;;  %v4063_v7 = vmov %v4052_v4  ;;  %v639_v53 = vadd.f32 %v637_v25, %v575_v35  ;;  %v4064_v19 = vstv %s2444_s8  ;;  %s4142_s8 = sld [smem:[#allocation74_spill]] }
 0x15a   : > { %v572_v41 = vmul.f32 %v4063_v7, %v2891_v44  ;;  %v1025_v4 = vmul.f32 %v4064_v19, %v3038_v51  ;;  %v4065_v27 = vstv %s3905_s18  ;;  %v4067_v6 = vstv %s3906_s1  ;;  %1322 = vrot.lane.b32.xlu1 %v1249_v55, %s2125_s13  ;;  %s4093_s1 = sld [smem:[#allocation87_spill]]  ;;  %s2128_s18 = smov 126  }
 0x15b   : > { %v1089_v11 = vmul.f32 %v4065_v27, %v3061_v23  ;;  %v1139_v46 = vmul.f32 %v4067_v6, %v3089_v29  ;;  %v1020_v26 = vadd.f32 %v1018_v37, %v970_v34  ;;  %v4068_v5 = vstv %s2454_s15 }
 0x15c   : > { %v1203_v17 = vmul.f32 %v4068_v5, %v3125_v28  ;;  %v524_v38 = vadd.f32 %v2921_v62, %v460_v21  ;;  %v4069_v25 = vstv %s4046_s16  ;;  %v689_v56 = vadd.f32 %v687_v10, %v639_v53 }
 0x15d   : > { %v636_v1 = vmul.f32 %v4069_v25, %v2944_v2  ;;  %v4071_v36 = vstv %s4062_s12  ;;  %v4072_v31 = vmov %v4060_v32  ;;  %v4073_v37 = vmov %v4061_v59 }
 0x15e   : > { %v3243_v57 = vmul.f32 %v4071_v36, %v3156_v61  ;;  %v686_v22 = vmul.f32 %v4072_v31, %v2960_v13  ;;  %v974_v35 = vmul.f32 %v4073_v37, %v3015_v45  ;;  %v1084_v32 = vadd.f32 %v1082_v54, %v1020_v26 }
 0x15f   : > { %v574_v62 = vadd.f32 %v572_v41, %v524_v38  ;;  %v473_v59 = vadd.f32 %v2808_v63, %v2872_v43  ;;  %v4075_v10 = vstv %s4066_s9  ;;  %v4076_v34 = vrot.slane %v2605_v33, %v2322_v50 }
 0x160   : > { %v585_v55 = vmul.f32 %v4075_v10, %v2894_v48  ;;  %v4078_v7 = vmov %v4064_v19  ;;  %v4079_v19 = vmov %v4065_v27  ;;  %v4081_v54 = vmov %v4067_v6 }
 0x161   : > { %v761_v21 = vadd.f32 %v4076_v34, %v689_v56  ;;  %v1024_v53 = vmul.f32 %v4078_v7, %v3035_v52  ;;  %v1088_v27 = vmul.f32 %v4079_v19, %v3052_v0  ;;  %v1138_v41 = vmul.f32 %v4081_v54, %v3086_v16 }
 0x162   : > { %v1134_v63 = vadd.f32 %v1132_v14, %v1084_v32  ;;  %v638_v43 = vadd.f32 %v636_v1, %v574_v62  ;;  %v537_v6 = vadd.f32 %v2957_v20, %v473_v59  ;;  %v4082_v26 = vstv %s4070_s6 }
 0x163   : > { %v649_v5 = vmul.f32 %v4082_v26, %v2947_v12  ;;  %v4083_v38 = vrot.slane %v2613_v15, %v2322_v50  ;;  %v4084_v56 = vstv %s2454_s15  ;;  %v4085_v31 = vstv %s4062_s12  ;;  %s4106_s15 = sld [smem:[#allocation88_spill]] }
 0x164   : > { %v1202_v36 = vmul.f32 %v4084_v56, %v3122_v18  ;;  %v3281_v37 = vmul.f32 %v4085_v31, %v3153_v40  ;;  %v4086_v14 = vstv %s4074_s29  ;;  %v1198_v20 = vadd.f32 %v1196_v3, %v1134_v63 }
 0x165   : > { %v873_v25 = vadd.f32 %v4083_v38, %v761_v21  ;;  %v699_v1 = vmul.f32 %v4086_v14, %v2963_v30  ;;  %v688_v32 = vadd.f32 %v686_v22, %v638_v43  ;;  %v587_v62 = vadd.f32 %v585_v55, %v537_v6 }
 0x166   : > { %v4087_v59 = vstv %s4077_s26  ;;  %v4088_v21 = vstv %s4080_s19  ;;  %v472_v19 = vadd.f32 %v2804_v60, %v2853_v24  ;;  %v4089_v54 = vstv %s4066_s9  ;;  %v4094_v60 = vld [vmem:[#allocation111_spill] sm:$0xff]  ;;  %s4203_s9 = sld [smem:[#allocation121_spill]] }
 0x167   : > { %v987_v10 = vmul.f32 %v4087_v59, %v3018_v39  ;;  %v977_v34 = vadd.f32 %v975_v42, %v873_v25  ;;  %v1037_v7 = vmul.f32 %v4088_v21, %v3038_v51  ;;  %v584_v26 = vmul.f32 %v4089_v54, %v2891_v44 }
 0x168   : > { %v1248_v38 = vadd.f32 %v1246_v8, %v1198_v20  ;;  %v4090_v3 = vrot.slane %v2605_v33, %v2320_v49  ;;  %v651_v55 = vadd.f32 %v649_v5, %v587_v62  ;;  %v4091_v42 = vstv %s2487_s4 }
 0x169   : > { %v1101_v63 = vmul.f32 %v4091_v42, %v3061_v23  ;;  %v1027_v43 = vadd.f32 %v1025_v4, %v977_v34  ;;  %v4092_v6 = vstv %s2509_s14  ;;  %v536_v24 = vadd.f32 %v4094_v60, %v472_v19 }
 0x16a   : > { %v760_v22 = vadd.f32 %v4090_v3, %v688_v32  ;;  %v1151_v25 = vmul.f32 %v4092_v6, %v3089_v29  ;;  %v4095_v56 = vstv %s4070_s6  ;;  %1320 = vrot.lane.b32.xlu0 %v1248_v38, %s2125_s13  ;;  %v4096_v33 = vrot.slane %v2613_v15, %v2320_v49 }
 0x16b   : > { %v648_v31 = vmul.f32 %v4095_v56, %v2944_v2  ;;  %v701_v5 = vadd.f32 %v699_v1, %v651_v55  ;;  %v4097_v4 = vstv %s2517_s23  ;;  %v4098_v20 = vstv %s2527_s22  ;;  %v4101_v1 = vld [vmem:[#allocation91_spill] sm:$0xff]  ;;  %v4104_v55 = vld [vmem:[#allocation104_spill] sm:$0xff] }
 0x16c   : > { %v872_v8 = vadd.f32 %v4096_v33, %v760_v22  ;;  %v1215_v14 = vmul.f32 %v4097_v4, %v3125_v28  ;;  %v3320_v32 = vmul.f32 %v4098_v20, %v3156_v61  ;;  %v1091_v62 = vadd.f32 %v1089_v11, %v1027_v43  ;;  %v4103_v22 = vld [vmem:[#allocation108_spill] sm:$0xff]  ;;  %v4111_v20 = vld [vmem:[#allocation113_spill] sm:$0xff] }
 0x16d   : > { %v586_v59 = vadd.f32 %v584_v26, %v536_v24  ;;  %v4099_v34 = vstv %s4074_s29  ;;  %v4100_v19 = vstv %s4077_s26  ;;  %v4102_v38 = vrot.slane %v4101_v1, %v2322_v50  ;;  %s2130_s26 = smov [#allocation12]  }
 0x16e   : > { %v698_v21 = vmul.f32 %v4099_v34, %v2960_v13  ;;  %v986_v15 = vmul.f32 %v4100_v19, %v3015_v45  ;;  %v976_v54 = vadd.f32 %v974_v35, %v872_v8  ;;  %v479_v42 = vadd.f32 %v4104_v55, %v4103_v22  ;;  %v4109_v8 = vld [vmem:[#allocation92_spill] sm:$0xff] }
 0x16f   : > { %v793_v3 = vadd.f32 %v4102_v38, %v701_v5  ;;  %v4105_v6 = vstv %s4093_s1  ;;  %v1141_v26 = vadd.f32 %v1139_v46, %v1091_v62  ;;  %v650_v43 = vadd.f32 %v648_v31, %v586_v59 }
 0x170   : > { %v591_v11 = vmul.f32 %v4105_v6, %v2894_v48  ;;  %v4107_v60 = vstv %s4080_s19  ;;  %v4108_v56 = vstv %s2487_s4  ;;  %v1026_v33 = vadd.f32 %v1024_v53, %v976_v54  ;;  %s2126_s4 = smov 1   ;;  %s2019_s19 = sshll.u32 %s2130_s26, 4  ;;  %s2020_s19 = int_to_ptr.vmem [resolvable:$false] %s2019_s19 }
 0x171   : > { %v1036_v24 = vmul.f32 %v4107_v60, %v3035_v52  ;;  %v1100_v35 = vmul.f32 %v4108_v56, %v3052_v0  ;;  %v4110_v5 = vrot.slane %v4109_v8, %v2322_v50  ;;  %v543_v34 = vadd.f32 %v4111_v20, %v479_v42 }
 0x172   : > { %v4112_v19 = vstv %s2475_s20  ;;  %v1205_v46 = vadd.f32 %v1203_v17, %v1141_v26  ;;  %v700_v31 = vadd.f32 %v698_v21, %v650_v43  ;;  %v4113_v62 = vstv %s2509_s14  ;;  %s2127_s14 = smov 127  }
 0x173   : > { %v905_v4 = vadd.f32 %v4110_v5, %v793_v3  ;;  %v655_v38 = vmul.f32 %v4112_v19, %v2947_v12  ;;  %v1150_v59 = vmul.f32 %v4113_v62, %v3086_v16  ;;  %v4114_v22 = vstv %s2517_s23  ;;  %s4169_s23 = sld [smem:[#allocation64_spill]] }
 0x174   : > { %v1214_v55 = vmul.f32 %v4114_v22, %v3122_v18  ;;  %v1090_v6 = vadd.f32 %v1088_v27, %v1026_v33  ;;  %v593_v54 = vadd.f32 %v591_v11, %v543_v34  ;;  %v4115_v3 = vstv %s4106_s15  ;;  %v4119_v33 = vld [vmem:[#allocation107_spill] sm:$0xff] }
 0x175   : > { %v989_v53 = vadd.f32 %v987_v10, %v905_v4  ;;  %v705_v42 = vmul.f32 %v4115_v3, %v2963_v30  ;;  %v1255_v60 = vadd.f32 %v3243_v57, %v1205_v46  ;;  %v4116_v17 = vrot.slane %v4101_v1, %v2320_v49  ;;  %v4120_v4 = vld [vmem:[#allocation103_spill] sm:$0xff] }
 0x176   : > { %v4117_v26 = vstv %s2527_s22  ;;  %v4118_v56 = vstv %s2535_s7  ;;  %v1140_v27 = vadd.f32 %v1138_v41, %v1090_v6  ;;  %v657_v11 = vadd.f32 %v655_v38, %v593_v54  ;;  %v4125_v6 = vld [vmem:[#allocation112_spill] sm:$0xff]  ;;  %s4149_s22 = sld [smem:[#allocation94_spill]] }
 0x177   : > { %v792_v21 = vadd.f32 %v4116_v17, %v700_v31  ;;  %v1264_v43 = vmul.f32 %v4117_v26, %v3153_v40  ;;  %v993_v5 = vmul.f32 %v4118_v56, %v3018_v39  ;;  %v1039_v10 = vadd.f32 %v1037_v7, %v989_v53  ;;  %1363 = vrot.lane.b32.xlu1 %v1255_v60, %s2126_s4 }
 0x178   : > { %v478_v20 = vadd.f32 %v4120_v4, %v4119_v33  ;;  %v4121_v57 = vrot.slane %v4109_v8, %v2320_v49  ;;  %v4122_v34 = vstv %s2545_s27  ;;  %v4123_v46 = vstv %s4093_s1  ;;  %s2021_s1 = scalar_lea.vmem %s2020_s19, 64 }
 0x179   : > { %v1043_v19 = vmul.f32 %v4122_v34, %v3038_v51  ;;  %v590_v41 = vmul.f32 %v4123_v46, %v2891_v44  ;;  %v4124_v7 = vstv %s2475_s20  ;;  %v1204_v31 = vadd.f32 %v1202_v36, %v1140_v27  ;;  %s4140_s20 = sld [smem:[#allocation90_spill]] }
 0x17a   : > { %v904_v1 = vadd.f32 %v4121_v57, %v792_v21  ;;  %v654_v38 = vmul.f32 %v4124_v7, %v2944_v2  ;;  %v1103_v62 = vadd.f32 %v1101_v63, %v1039_v10  ;;  %v707_v22 = vadd.f32 %v705_v42, %v657_v11  ;;  %v4129_v63 = vld [vmem:[#allocation93_spill] sm:$0xff]  ;;  %v4137_v7 = vld [vmem:[#allocation106_spill] sm:$0xff] }
 0x17b   : > { %v542_v53 = vadd.f32 %v4125_v6, %v478_v20  ;;  %v4126_v8 = vstv %s3924_s10  ;;  %v4127_v60 = vstv %s2591_s2  ;;  %v4128_v21 = vstv %s4106_s15 }
 0x17c   : > { %v988_v54 = vadd.f32 %v986_v15, %v904_v1  ;;  %v1107_v3 = vmul.f32 %v4126_v8, %v3061_v23  ;;  %v1157_v17 = vmul.f32 %v4127_v60, %v3089_v29  ;;  %v704_v26 = vmul.f32 %v4128_v21, %v2960_v13 }
 0x17d   : > { %v1254_v56 = vadd.f32 %v3281_v37, %v1204_v31  ;;  %v1153_v36 = vadd.f32 %v1151_v25, %v1103_v62  ;;  %v4130_v42 = vrot.slane %v4129_v63, %v2322_v50  ;;  %v592_v15 = vadd.f32 %v590_v41, %v542_v53  ;;  %v4134_v25 = vld [vmem:[#allocation95_spill] sm:$0xff] }
 0x17e   : > { %v1038_v10 = vadd.f32 %v1036_v24, %v988_v54  ;;  %v4131_v11 = vstv %s2598_s30  ;;  %v4132_v4 = vstv %s3926_s5  ;;  %v4133_v57 = vstv %s2535_s7  ;;  %v4136_v24 = vld [vmem:[#allocation110_spill] sm:$0xff]  ;;  %s4154_s7 = sld [smem:[#allocation97_spill]] }
 0x17f   : > { %v809_v27 = vadd.f32 %v4130_v42, %v707_v22  ;;  %v1221_v33 = vmul.f32 %v4131_v11, %v3125_v28  ;;  %v1271_v20 = vmul.f32 %v4132_v4, %v3156_v61  ;;  %v992_v1 = vmul.f32 %v4133_v57, %v3015_v45  ;;  %1361 = vrot.lane.b32.xlu0 %v1254_v56, %s2126_s4  ;;  %s4189_s30 = sld [smem:[#allocation98_spill]] }
 0x180   : > { %v1217_v37 = vadd.f32 %v1215_v14, %v1153_v36  ;;  %v4135_v34 = vrot.slane %v4134_v25, %v2322_v50  ;;  %v656_v41 = vadd.f32 %v654_v38, %v592_v15  ;;  %v485_v31 = vadd.f32 %v4137_v7, %v4136_v24 }
 0x181   : > { %v1102_v62 = vadd.f32 %v1100_v35, %v1038_v10  ;;  %v4138_v22 = vstv %s2545_s27  ;;  %v4139_v53 = vstv %s3921_s24  ;;  %v4141_v8 = vstv %s3922_s0  ;;  %s4146_s27 = sld [smem:[#allocation82_spill]] }
 0x182   : > { %v921_v46 = vadd.f32 %v4135_v34, %v809_v27  ;;  %v1042_v6 = vmul.f32 %v4138_v22, %v3035_v52  ;;  %v597_v54 = vmul.f32 %v4139_v53, %v2894_v48  ;;  %v661_v60 = vmul.f32 %v4141_v8, %v2947_v12  ;;  %s4162_s24 = sld [smem:[#allocation83_spill]] }
 0x183   : > { %v1267_v14 = vadd.f32 %v3320_v32, %v1217_v37  ;;  %v706_v38 = vadd.f32 %v704_v26, %v656_v41  ;;  %v549_v56 = vadd.f32 %v3161_v9, %v485_v31  ;;  %v1152_v36 = vadd.f32 %v1150_v59, %v1102_v62  ;;  %v4153_v41 = vld [vmem:[#allocation105_spill] sm:$0xff] }
 0x184   : > { %v995_v21 = vadd.f32 %v993_v5, %v921_v46  ;;  %v4143_v35 = vstv %s3924_s10  ;;  %v4144_v27 = vstv %s2591_s2  ;;  %v4145_v48 = vmov %v4131_v11  ;;  %s4151_s2 = sld [smem:[#allocation96_spill]]  ;;  %v4152_v46 = vld [vmem:[#allocation109_spill] sm:$0xff] }
 0x185   : > { %v1106_v42 = vmul.f32 %v4143_v35, %v3052_v0  ;;  %v1156_v15 = vmul.f32 %v4144_v27, %v3086_v16  ;;  %v1220_v10 = vmul.f32 %v4145_v48, %v3122_v18  ;;  %1404 = vrot.lane.b32.xlu1 %v1267_v14, %s2127_s14  ;;  %v4147_v32 = vrot.slane %v4129_v63, %v2320_v49  ;;  %s4200_s10 = sld [smem:[#allocation28_spill]] }
 0x186   : > { %v1045_v12 = vadd.f32 %v1043_v19, %v995_v21  ;;  %v599_v59 = vadd.f32 %v597_v54, %v549_v56  ;;  %v4148_v5 = vstv %s4140_s20  ;;  %v1216_v11 = vadd.f32 %v1214_v55, %v1152_v36  ;;  %v4158_v54 = vld [vmem:[#allocation116_spill] sm:$0xff] }
 0x187   : > { %v808_v9 = vadd.f32 %v4147_v32, %v706_v38  ;;  %v711_v26 = vmul.f32 %v4148_v5, %v2963_v30  ;;  %v1270_v57 = vmul.f32 %v4132_v4, %v3153_v40  ;;  %v4150_v37 = vstv %s4142_s8 }
 0x188   : > { %v999_v34 = vmul.f32 %v4150_v37, %v3018_v39  ;;  %v484_v19 = vadd.f32 %v4153_v41, %v4152_v46  ;;  %v1109_v24 = vadd.f32 %v1107_v3, %v1045_v12  ;;  %v4155_v63 = vrot.slane %v4134_v25, %v2320_v49  ;;  %v4171_v46 = vld [vmem:[#allocation101_spill] sm:$0xff] }
 0x189   : > { %v663_v30 = vadd.f32 %v661_v60, %v599_v59  ;;  %v4156_v55 = vmov %v4139_v53  ;;  %v1266_v62 = vadd.f32 %v1264_v43, %v1216_v11  ;;  %v4157_v22 = vstv %s4146_s27 }
 0x18a   : > { %v920_v7 = vadd.f32 %v4155_v63, %v808_v9  ;;  %v596_v31 = vmul.f32 %v4156_v55, %v2891_v44  ;;  %v1049_v53 = vmul.f32 %v4157_v22, %v3038_v51  ;;  %v548_v8 = vadd.f32 %v4158_v54, %v484_v19  ;;  %v4178_v54 = vld [vmem:[#allocation102_spill] sm:$0xff] }
 0x18b   : > { %v4159_v14 = vstv %s3922_s0  ;;  %v1159_v21 = vadd.f32 %v1157_v17, %v1109_v24  ;;  %v713_v25 = vadd.f32 %v711_v26, %v663_v30  ;;  %v4160_v56 = vstv %s4149_s22  ;;  %1402 = vrot.lane.b32.xlu0 %v1266_v62, %s2127_s14  ;;  %s4185_s0 = sld [smem:[#allocation65_spill]]  ;;  %s1698_s17 = sshll.u32 %s4200_s10, 1 }
 0x18c   : > { %v660_v3 = vmul.f32 %v4159_v14, %v2944_v2  ;;  %v994_v38 = vadd.f32 %v992_v1, %v920_v7  ;;  %v1113_v60 = vmul.f32 %v4160_v56, %v3061_v23  ;;  %v4161_v44 = vstv %s4151_s2  ;;  %v4165_v1 = vld [vmem:[#allocation99_spill] sm:$0xff]  ;;  %v4175_v7 = vld [vmem:[#allocation100_spill] sm:$0xff]  ;;  %s268_s25 = scalar_lea.vmem [#allocation12], %s1698_s17  ;;  %s1557_s6 = scalar_lea.sflag [#allocation6], %s4200_s10 }
 0x18d   : > { %v1163_v43 = vmul.f32 %v4161_v44, %v3089_v29  ;;  %v4163_v36 = vstv %s4154_s7  ;;  %v598_v27 = vadd.f32 %v596_v31, %v548_v8  ;;  %v4164_v48 = vmov %v4148_v5  ;;  %s1571_s21 = sshll.u32 %s268_s25, 4  ;;  %s1572_s21 = int_to_ptr.vmem [resolvable:$true] %s1571_s21 }
 0x18e   : > { %v1227_v35 = vmul.f32 %v4163_v36, %v3125_v28  ;;  %v710_v12 = vmul.f32 %v4164_v48, %v2960_v13  ;;  %v1223_v2 = vadd.f32 %v1221_v33, %v1159_v21  ;;  %v1044_v17 = vadd.f32 %v1042_v6, %v994_v38  ;;  %v4173_v33 = vld [vmem:[#allocation115_spill] sm:$0xff]  ;;  %s2015_s29 = scalar_lea.vmem %s1572_s21, 32  ;;  %p2022_p2 = scmp.lt.s32.totalorder %s1572_s21, %s2020_s19 }
 0x18f   : > { %v4166_v32 = vrot.slane %v4165_v1, %v2322_v50  ;;  %v4167_v59 = vmov %v4150_v37  ;;  %v662_v26 = vadd.f32 %v660_v3, %v598_v27  ;;  %v4168_v11 = vmov %v4157_v22  ;;  %v4170_v37 = vld [vmem:[#allocation114_spill] sm:$0xff]  ;;  %p2016_p4 = scmp.ne.s32.totalorder %s1572_s21, %s2015_s29  ;;  %p2023_p11 = scmp.lt.s32.totalorder %s2021_s1, %s2015_s29 }
 0x190   : > { %v998_v5 = vmul.f32 %v4167_v59, %v3015_v45  ;;  %v1048_v4 = vmul.f32 %v4168_v11, %v3035_v52  ;;  %v4172_v41 = vrot.slane %v4171_v46, %v2320_v49  ;;  %v4174_v6 = vrot.slane %v4171_v46, %v2322_v50 }
 0x191   : > { %v825_v9 = vadd.f32 %v4166_v32, %v713_v25  ;;  %v1273_v24 = vadd.f32 %v1271_v20, %v1223_v2  ;;  %v1108_v63 = vadd.f32 %v1106_v42, %v1044_v17  ;;  %v4176_v30 = vrot.slane %v4175_v7, %v2322_v50  ;;  %p2017_p8 = pnand %p2016_p4, %p2249_p10  ;;  %p2024_p13 = por %p2023_p11, %p2022_p2 }
 0x192   : > { %v776_v13 = vadd.f32 %v4172_v41, %v4170_v37  ;;  %v777_v19 = vadd.f32 %v4174_v6, %v4173_v33  ;;  %v4177_v31 = vstv %s4162_s24  ;;  %v712_v22 = vadd.f32 %v710_v12, %v662_v26 }
 0x193   : > { %v937_v55 = vadd.f32 %v4176_v30, %v825_v9  ;;  %v980_v62 = vmul.f32 %v4177_v31, %v3015_v45  ;;  %v4179_v8 = vrot.slane %v4178_v54, %v2320_v49  ;;  %v4180_v3 = vrot.slane %v4178_v54, %v2322_v50  ;;  %1445 = vrot.lane.b32.xlu1 %v1273_v24, %s2128_s18  ;;  %p2018_p9 = pneg %p2017_p8 }
 0x194   : > { %v4181_v42 = vmov %v4177_v31  ;;  %v1158_v38 = vadd.f32 %v1156_v15, %v1108_v63  ;;  %v4182_v45 = vstv %s4169_s23  ;;  %v4184_v27 = vrot.slane %v4165_v1, %v2320_v49 }
 0x195   : > { %v888_v14 = vadd.f32 %v4179_v8, %v776_v13  ;;  %v889_v20 = vadd.f32 %v4180_v3, %v777_v19  ;;  %v981_v21 = vmul.f32 %v4181_v42, %v3018_v39  ;;  %v1001_v25 = vadd.f32 %v999_v34, %v937_v55  ;;  %p2025_p0 = pnand %p2024_p13, %p2018_p9 }
 0x196   : > { %v1030_v56 = vmul.f32 %v4182_v45, %v3035_v52  ;;  %v4183_v44 = vmov %v4182_v45  ;;  %v824_v48 = vadd.f32 %v4184_v27, %v712_v22  ;;  %v4186_v39 = vstv %s2710_s11  ;;  %s4201_s11 = sld [smem:[#allocation21_spill]] }
 0x197   : > { %v1031_v36 = vmul.f32 %v4183_v44, %v3038_v51  ;;  %v982_v12 = vadd.f32 %v980_v62, %v888_v14  ;;  %v983_v2 = vadd.f32 %v981_v21, %v889_v20  ;;  %v1094_v17 = vmul.f32 %v4186_v39, %v3052_v0 }
 0x198   : > { %v1222_v15 = vadd.f32 %v1220_v10, %v1158_v38  ;;  %v1051_v34 = vadd.f32 %v1049_v53, %v1001_v25  ;;  %v4187_v32 = vmov %v4186_v39  ;;  %v4188_v9 = vstv %s2719_s28  ;;  %s2129_s28 = smov 125  }
 0x199   : > { %v1095_v52 = vmul.f32 %v4187_v32, %v3061_v23  ;;  %v1144_v51 = vmul.f32 %v4188_v9, %v3086_v16  ;;  %v4190_v1 = vrot.slane %v4175_v7, %v2320_v49  ;;  %v1032_v26 = vadd.f32 %v1030_v56, %v982_v12  ;;  %v4199_v32 = vld [vmem:[#allocation30_spill] sm:$0xff] }
 0x19a   : > { %v1033_v11 = vadd.f32 %v1031_v36, %v983_v2  ;;  %v4191_v37 = vmov %v4188_v9  ;;  %v1272_v10 = vadd.f32 %v1270_v57, %v1222_v15  ;;  %v1115_v53 = vadd.f32 %v1113_v60, %v1051_v34 }
 0x19b   : > { %v936_v59 = vadd.f32 %v4190_v1, %v824_v48  ;;  %v1145_v46 = vmul.f32 %v4191_v37, %v3089_v29  ;;  %v4192_v23 = vstv %s4149_s22  ;;  %v4193_v13 = vstv %s4185_s0 }
 0x19c   : > { %v1112_v41 = vmul.f32 %v4192_v23, %v3052_v0  ;;  %v1208_v33 = vmul.f32 %v4193_v13, %v3122_v18  ;;  %v1096_v19 = vadd.f32 %v1094_v17, %v1032_v26  ;;  %v1097_v24 = vadd.f32 %v1095_v52, %v1033_v11  ;;  %1443 = vrot.lane.b32.xlu0 %v1272_v10, %s2128_s18  ;;  %s1804_s16 = sshll.u32 %s4201_s11, 5 }
 0x19d   : > { %v1000_v6 = vadd.f32 %v998_v5, %v936_v59  ;;  %v4194_v63 = vmov %v4193_v13  ;;  %v1165_v30 = vadd.f32 %v1163_v43, %v1115_v53  ;;  %v4195_v29 = vstv %s4189_s30  ;;  %v1287_v53 = vld [vmem:[#allocation9] sm:$0x3]  ;;  %s1569_s13 = scalar_lea.hbm %s4203_s9, %s1804_s16 }
 0x19e   : > { %v1209_v7 = vmul.f32 %v4194_v63, %v3125_v28  ;;  %v1277_v57 = vmul.f32 %v4195_v29, %v3156_v61  ;;  %v4196_v60 = vstv %s4151_s2  ;;  %v1258_v0 = vmul.f32 %v1257_v47, %v3153_v40 }
 0x19f   : > { %v1162_v55 = vmul.f32 %v4196_v60, %v3086_v16  ;;  %v1050_v31 = vadd.f32 %v1048_v4, %v1000_v6  ;;  %v1146_v62 = vadd.f32 %v1144_v51, %v1096_v19  ;;  %v1147_v5 = vadd.f32 %v1145_v46, %v1097_v24  ;;  %v1328_v6 = vld [vmem:[#allocation9 + $0x2] sm:$0x3] }
 0x1a0   : > { %v1259_v22 = vmul.f32 %v1257_v47, %v3156_v61  ;;  %v1229_v54 = vadd.f32 %v1227_v35, %v1165_v30  ;;  %v4197_v8 = vstv %s4154_s7  ;;  %v4198_v16 = vmov %v4195_v29 }
 0x1a1   : > { %v1114_v28 = vadd.f32 %v1112_v41, %v1050_v31  ;;  %v1226_v43 = vmul.f32 %v4197_v8, %v3122_v18  ;;  %v1210_v14 = vadd.f32 %v1208_v33, %v1146_v62  ;;  %v1211_v3 = vadd.f32 %v1209_v7, %v1147_v5  ;;  %v1369_v7 = vld [vmem:[#allocation9 + $0x4] sm:$0x3] }
 0x1a2   : > { %v1279_v20 = vadd.f32 %v1277_v57, %v1229_v54  ;;  %v1276_v21 = vmul.f32 %v4198_v16, %v3153_v40  ;;  %v1451_v54 = vld [vmem:[#allocation9 + $0xa] sm:$0x3] }
 0x1a3   : > { %v1164_v42 = vadd.f32 %v1162_v55, %v1114_v28  ;;  %v3552_v38 = vadd.f32 %v1258_v0, %v1210_v14  ;;  %v3554_v4 = vadd.f32 %v1259_v22, %v1211_v3  ;;  %v1410_v0 = vld [vmem:[#allocation9 + $0x8] sm:$0x3] }
 0x1a4   : > { %1486 = vrot.lane.b32.xlu1 %v1279_v20, %s2129_s28 }
 0x1a5   : > { %v1228_v25 = vadd.f32 %v1226_v43, %v1164_v42 }
 0x1a7   : > { %v1278_v61 = vadd.f32 %v1276_v21, %v1228_v25 }
 0x1a9   : > { %1484 = vrot.lane.b32.xlu0 %v1278_v61, %s2129_s28 }
 0x1c4   : > { %v1283_v47 = vpop.permute.xlu1 %1282 }
 0x1c5   : > { %v1281_v35 = vpop.permute.xlu0 %1280 }
 0x1c6   : > { %v1285_v40 = vsel %vm1284_vm8, %v1281_v35, %v1283_v47  ;;  %v1286_v36 = vsel %vm1284_vm8, %v1283_v47, %v1281_v35 }
 0x1c7   : > { %v1290_v12 = vcombine.low %v1286_v36, %v1285_v40 }
 0x1c9   : > { %v1297_v52 = vrot.slane %v1290_v12, %v4199_v32 }
 0x1cb   : > { %v1304_v37 = vrot.slane %v1297_v52, %v4199_v32 }
 0x1cc   : > { %v1323_v45 = vpop.permute.xlu1 %1322 }
 0x1cd   : > { %v1306_v24 = vmul.f32 %v1304_v37, %v1287_v53 }
 0x1cf   : > { %v1311_v60 = vrot.slane %v1306_v24, %v2320_v49  ;;  %v1315_v31 = vrot.slane %v1306_v24, %v2322_v50 }
 0x1d1   : > { %v1318_v14 = vadd.f32 %v1311_v60, %v3552_v38  ;;  %v1319_v16 = vadd.f32 %v1315_v31, %v3554_v4  ;;  %v1492_v38 = vld [vmem:[#allocation9 + $0xc] sm:$0x3] }
 0x1dc   : > { %v1321_v18 = vpop.permute.xlu0 %1320 }
 0x1dd   : > { %v1325_v27 = vsel %vm1324_vm9, %v1321_v18, %v1323_v45  ;;  %v1326_v48 = vsel %vm1324_vm9, %v1323_v45, %v1321_v18 }
 0x1de   : > { %v1331_v34 = vcombine.low %v1326_v48, %v1325_v27 }
 0x1e0   : > { %v1338_v59 = vrot.slane %v1331_v34, %v4199_v32 }
 0x1e2   : > { %v1345_v13 = vrot.slane %v1338_v59, %v4199_v32 }
 0x1e4   : > { %v1347_v29 = vmul.f32 %v1345_v13, %v1328_v6 }
 0x1e6   : > { %v1352_v22 = vrot.slane %v1347_v29, %v2320_v49  ;;  %v1356_v28 = vrot.slane %v1347_v29, %v2322_v50 }
 0x1e8   : > { %v1359_v58 = vadd.f32 %v1352_v22, %v1318_v14  ;;  %v1360_v47 = vadd.f32 %v1356_v28, %v1319_v16 }
 0x1e9   : > { %v1364_v56 = vpop.permute.xlu1 %1363 }
 0x1f1   : > { %v1362_v44 = vpop.permute.xlu0 %1361 }
 0x1f2   : > { %v1366_v39 = vsel %vm1365_vm10, %v1362_v44, %v1364_v56  ;;  %v1367_v17 = vsel %vm1365_vm10, %v1364_v56, %v1362_v44 }
 0x1f3   : > { %v1372_v9 = vcombine.low %v1367_v17, %v1366_v39 }
 0x1f5   : > { %v1379_v46 = vrot.slane %v1372_v9, %v4199_v32 }
 0x1f7   : > { %v1405_v2 = vpop.permute.xlu1 %1404  ;;  %v1386_v63 = vrot.slane %v1379_v46, %v4199_v32 }
 0x1f9   : > { %v1388_v55 = vmul.f32 %v1386_v63, %v1369_v7 }
 0x1fb   : > { %v1393_v3 = vrot.slane %v1388_v55, %v2320_v49  ;;  %v1397_v21 = vrot.slane %v1388_v55, %v2322_v50 }
 0x1fd   : > { %v1403_v15 = vpop.permute.xlu0 %1402  ;;  %v1400_v56 = vadd.f32 %v1393_v3, %v1359_v58  ;;  %v1401_v44 = vadd.f32 %v1397_v21, %v1360_v47 }
 0x1fe   : > { %v1407_v51 = vsel %vm1406_vm11, %v1403_v15, %v1405_v2  ;;  %v1408_v1 = vsel %vm1406_vm11, %v1405_v2, %v1403_v15 }
 0x1ff   : > { %v1413_v11 = vcombine.low %v1407_v51, %v1408_v1 }
 0x201   : > { %v1420_v19 = vrot.slane %v1413_v11, %v4199_v32 }
 0x203   : > { %v1427_v57 = vrot.slane %v1420_v19, %v4199_v32 }
 0x205   : > { %v1446_v26 = vpop.permute.xlu1 %1445  ;;  %v1429_v8 = vmul.f32 %v1427_v57, %v1410_v0 }
 0x207   : > { %v1434_v35 = vrot.slane %v1429_v8, %v2320_v49  ;;  %v1438_v45 = vrot.slane %v1429_v8, %v2322_v50 }
 0x209   : > { %v1441_v27 = vadd.f32 %v1434_v35, %v1400_v56  ;;  %v1442_v48 = vadd.f32 %v1438_v45, %v1401_v44 }
 0x20e   : > { %v1444_v10 = vpop.permute.xlu0 %1443 }
 0x20f   : > { %v1448_v23 = vsel %vm1447_vm12, %v1444_v10, %v1446_v26  ;;  %v1449_v41 = vsel %vm1447_vm12, %v1446_v26, %v1444_v10 }
 0x210   : > { %v1454_v33 = vcombine.low %v1448_v23, %v1449_v41 }
 0x212   : > { %v1461_v30 = vrot.slane %v1454_v33, %v4199_v32 }
 0x214   : > { %v1468_v62 = vrot.slane %v1461_v30, %v4199_v32 }
 0x216   : > { %v1487_v5 = vpop.permute.xlu1 %1486  ;;  %v1470_v25 = vmul.f32 %v1468_v62, %v1451_v54 }
 0x218   : > { %v1475_v40 = vrot.slane %v1470_v25, %v2320_v49  ;;  %v1479_v36 = vrot.slane %v1470_v25, %v2322_v50 }
 0x21a   : > { %v1482_v2 = vadd.f32 %v1475_v40, %v1441_v27  ;;  %v1483_v39 = vadd.f32 %v1479_v36, %v1442_v48 }
 0x21b   : > { %v1485_v43 = vpop.permute.xlu0 %1484 }
 0x21c   : > { %v1489_v20 = vsel %vm1488_vm13, %v1485_v43, %v1487_v5  ;;  %v1490_v42 = vsel %vm1488_vm13, %v1487_v5, %v1485_v43 }
 0x21d   : > { %v1495_v61 = vcombine.low %v1489_v20, %v1490_v42 }
 0x21f   : > { %v1502_v18 = vrot.slane %v1495_v61, %v4199_v32 }
 0x221   : > { %v1509_v4 = vrot.slane %v1502_v18, %v4199_v32 }
 0x223   : > { %v1511_v12 = vmul.f32 %v1509_v4, %v1492_v38 }
 0x225   : > { %v1516_v17 = vrot.slane %v1511_v12, %v2320_v49  ;;  %v1520_v15 = vrot.slane %v1511_v12, %v2322_v50 }
 0x227   : > { %v1523_v34 = vadd.f32 %v1516_v17, %v1482_v2  ;;  %v1524_v52 = vadd.f32 %v1520_v15, %v1483_v39 }
 0x229   : > { %v1796_v9 = vmul.f32 -1.442695, %v1523_v34  ;;  %v1797_v51 = vmul.f32 -1.442695, %v1524_v52 }
 0x22b   : > { %1916 = vpow2.f32 %v1796_v9 }
 0x22c   : > { %1918 = vpow2.f32 %v1797_v51 }
 0x238   : > { %v1917_v1 = vpop.eup %1916 }
 0x239   : > { %v1919_v59 = vpop.eup %1918  ;;  %v1531_v26 = vadd.f32 1.0, %v1917_v1 }
 0x23a   : > { %v1532_v11 = vadd.f32 1.0, %v1919_v59 }
 0x23b   : > { %1920 = vrcp.f32 %v1531_v26 }
 0x23c   : > { %1922 = vrcp.f32 %v1532_v11 }
 0x248   : > { %v1921_v37 = vpop.eup %1920 }
 0x249   : > { %v1923_v49 = vpop.eup %1922 }
 0x24a   : > { %v1539_v46 = vcombine.low %v1921_v37, %v1923_v49 }
 0x24c   : > { %v1546_v50 = vrot.slane %v1539_v46, %v4199_v32 }
 0x24e   : > { %v1553_v10 = vrot.slane %v1546_v50, %v4199_v32 }
 0x250   : > { %1555 = vst.msk [vmem:[%s268_s25] sm:$0x3] %vm2301_vm1, %v1553_v10 }
 0x251   : > { %2028 = shalt.err (!%p2025_p0)
}
 0x252   : > { %s2029_s15 = scalar_lea.hbm %s1569_s13, 32  ;;  %s2033_s8 = scalar_lea.hbm %s4203_s9, 64 }
 0x253   : > { %p2030_p5 = scmp.ne.s32.totalorder %s1569_s13, %s2029_s15  ;;  %p2034_p1 = scmp.lt.s32.totalorder %s1569_s13, %s4203_s9 }
 0x254   : > { %p2035_p3 = scmp.lt.s32.totalorder %s2033_s8, %s2029_s15 }
 0x255   : > { %p2031_p12 = pnand %p2030_p5, %p2249_p10 }
 0x256   : > { %p2036_p4 = por %p2035_p3, %p2034_p1 }
 0x257   : > { %p2032_p7 = pneg %p2031_p12 }
 0x259   : > { %p2037_p8 = pnand %p2036_p4, %p2032_p7 }
 0x25b   : > { %2040 = shalt.err (!%p2037_p8)
}
 0x25c   : > { %1819 = dma.vmem_to_hbm [thread:$0]  (%p2249_p10), %s1572_s21, 32, %s1569_s13, %s1557_s6  }
 0x25d PF: > { %s4205_s22 = sld [smem:[#allocation18_spill]] }
 0x25e   : > { %s4207_s7 = sld [smem:[#allocation23_spill]] }
 0x263   : > { %s1583_s24 = sand.u32 1, %s4205_s22  }
 0x264   : > { %p4208_p9 = scmp.ge.s32.totalorder %s4207_s7, 2  ;;  %s1584_s23 = scalar_lea.sflag [#allocation6], %s1583_s24 }
 0x266   : > { %p1836_p2 = pnand %p4208_p9, %p2201_p6 }
 0x268   : > { %p1837_p11 = pneg %p1836_p2 }
 0x26a   : > { %2082 = dma.done.wait (%p1837_p11), %s1584_s23, 32  }
 0x26b   : > { %2084 = vsyncadd (%p1837_p11), %s1584_s23, 4294967264  ;;  %s20_s20 = sadd.s32 1, %s4207_s7   ;;  %s4209_s15 = sld [smem:[#allocation19_spill]] }
 0x26c   : > { %p17_p13 = scmp.ge.s32.totalorder %s20_s20, 4   ;;  %s4210_s16 = sld [smem:[#allocation20_spill]] }
 0x26d   : > { %s4211_s17 = sld [smem:[#allocation27_spill]] }
 0x26e   : > { %s4212_s18 = sld [smem:[#allocation22_spill]]  ;;  %19 = sbr.rel (!%p17_p13) target bundleno = 13 (0xd), region = 111 }
 0x26f   : > { %s4213_s19 = sld [smem:[#allocation26_spill]] }
 0x273   :  { %1589 = vsyncpa [#allocation5], 1 }
 0x274   :  { %1591 = vsyncpa [#allocation5 + $0x1], 1 }
 0x275   :  { %1592 = vsyncpa [#allocation10], 1 }
 0x276   :  { %1593 = vsyncpa [#allocation6], 1 }
 0x277   :  { %1595 = vsyncpa [#allocation6 + $0x1], 1 }
 0x278   :  { %1596 = vsyncpa [#allocation7], 1 }
 0x279   :  { %1598 = vsyncpa [#allocation7 + $0x1], 1 }

</bundles_post_ra>
